<compile_context>
chip_gen: v7x
topology: tpu7x:2x2x1
jax: 0.10.0
libtpu: 0.0.40
codegen_flags: <defaults>
</compile_context>

<pallas_src>
import functools
import math

import jax
import jax.numpy as jnp
from jax import lax
from jax.experimental import pallas as pl
from jax.experimental.pallas import tpu as pltpu

# Make the pure-JAX reference use full-precision matmuls so the tolerance
# check against the f32-accumulating Pallas kernel is meaningful.
jax.config.update("jax_default_matmul_precision", "highest")


def _sigmoid(x):
    return 1.0 / (1.0 + jnp.exp(-x))


def bilstm_kernel(
    x_ref,                               # (L*Bp, I)   time-major, batch-padded
    w_ih_f_ref, w_hh_f_ref, b_f_ref,     # forward dir: (I,4H), (H,4H), (1,4H)
    w_ih_b_ref, w_hh_b_ref, b_b_ref,     # backward dir: (I,4H), (H,4H), (1,4H)
    out_ref,                             # (L*Bp, 2H)
    xg_f_ref, xg_b_ref,                  # scratch (L*Bp, 4H): hoisted x-projections
    hf_ref, hb_ref,                      # scratch (L*Bp, H): per-direction hiddens
    *, seq_len, batch, hidden,
):
    L, Bp, H = seq_len, batch, hidden

    # Hoisted input projections (one MXU matmul per direction for all timesteps).
    x2d = x_ref[...]
    xg_f_ref[...] = (
        jnp.dot(x2d, w_ih_f_ref[...], preferred_element_type=jnp.float32)
        + b_f_ref[...]
    )
    xg_b_ref[...] = (
        jnp.dot(x2d, w_ih_b_ref[...], preferred_element_type=jnp.float32)
        + b_b_ref[...]
    )

    w_hh_f = w_hh_f_ref[...]
    w_hh_b = w_hh_b_ref[...]

    def step(t, carry):
        h_f, c_f, h_b, c_b = carry

        # ---- forward direction, time t ----
        rf = pl.multiple_of(t * Bp, 8)
        g = xg_f_ref[pl.ds(rf, Bp), :] + jnp.dot(
            h_f, w_hh_f, preferred_element_type=jnp.float32)
        i_g = _sigmoid(g[:, 0:H])
        f_g = _sigmoid(g[:, H:2 * H])
        c_g = jnp.tanh(g[:, 2 * H:3 * H])
        o_g = _sigmoid(g[:, 3 * H:4 * H])
        c_f = f_g * c_f + i_g * c_g
        h_f = o_g * jnp.tanh(c_f)
        hf_ref[pl.ds(rf, Bp), :] = h_f

        # ---- backward direction, time L-1-t ----
        rb = pl.multiple_of((L - 1 - t) * Bp, 8)
        g = xg_b_ref[pl.ds(rb, Bp), :] + jnp.dot(
            h_b, w_hh_b, preferred_element_type=jnp.float32)
        i_g = _sigmoid(g[:, 0:H])
        f_g = _sigmoid(g[:, H:2 * H])
        c_g = jnp.tanh(g[:, 2 * H:3 * H])
        o_g = _sigmoid(g[:, 3 * H:4 * H])
        c_b = f_g * c_b + i_g * c_g
        h_b = o_g * jnp.tanh(c_b)
        hb_ref[pl.ds(rb, Bp), :] = h_b

        return h_f, c_f, h_b, c_b

    zeros = jnp.zeros((Bp, H), jnp.float32)     # rand_init_hidden returns zeros
    lax.fori_loop(0, L, step, (zeros, zeros, zeros, zeros))

    # out[t] = concat([h_fwd[t], h_bwd[t]]) -> single lane-dense store.
    out_ref[...] = jnp.concatenate([hf_ref[...], hb_ref[...]], axis=-1)


def bilstm_forward(x, params):
    """x: (B, L, in_feature) batch-first. Returns (B, L, 2*out_feature)."""
    B, L, I = x.shape
    H = params["w_hh_f"].shape[0]
    Bp = ((B + 7) // 8) * 8                      # pad batch to sublane multiple

    x_t = jnp.transpose(x, (1, 0, 2))            # (L, B, I) time-major
    if Bp != B:
        x_t = jnp.pad(x_t, ((0, 0), (0, Bp - B), (0, 0)))
    x2d = x_t.reshape(L * Bp, I)                 # layout plumbing outside kernel

    vmem = pl.BlockSpec(memory_space=pltpu.MemorySpace.VMEM)
    kernel = functools.partial(bilstm_kernel, seq_len=L, batch=Bp, hidden=H)

    out2d = pl.pallas_call(
        kernel,
        out_shape=jax.ShapeDtypeStruct((L * Bp, 2 * H), jnp.float32),
        in_specs=[vmem] * 7,
        out_specs=vmem,
        scratch_shapes=[
            pltpu.VMEM((L * Bp, 4 * H), jnp.float32),   # xg_f
            pltpu.VMEM((L * Bp, 4 * H), jnp.float32),   # xg_b
            pltpu.VMEM((L * Bp, H), jnp.float32),       # hf
            pltpu.VMEM((L * Bp, H), jnp.float32),       # hb
        ],
    )(
        x2d,
        params["w_ih_f"], params["w_hh_f"], params["b_f"],
        params["w_ih_b"], params["w_hh_b"], params["b_b"],
    )

    out = out2d.reshape(L, Bp, 2 * H)[:, :B, :]  # drop padded batch rows
    return jnp.transpose(out, (1, 0, 2))         # (B, L, 2H)


def bilstm_reference(x, params):
    """Pure-JAX mirror of the PyTorch BiLSTM forward (zero init state)."""
    B, L, I = x.shape
    H = params["w_hh_f"].shape[0]

    def run(xs, w_ih, w_hh, b):
        def cell(carry, x_t):
            h, c = carry
            g = x_t @ w_ih + h @ w_hh + b[0]
            i = _sigmoid(g[:, 0:H])
            f = _sigmoid(g[:, H:2 * H])
            gg = jnp.tanh(g[:, 2 * H:3 * H])
            o = _sigmoid(g[:, 3 * H:4 * H])
            c = f * c + i * gg
            h = o * jnp.tanh(c)
            return (h, c), h
        h0 = jnp.zeros((B, H), jnp.float32)
        _, hs = lax.scan(cell, (h0, h0), xs)
        return hs                                 # (L, B, H)

    xs = jnp.transpose(x, (1, 0, 2))
    h_f = run(xs, params["w_ih_f"], params["w_hh_f"], params["b_f"])
    h_b = run(xs[::-1], params["w_ih_b"], params["w_hh_b"], params["b_b"])[::-1]
    return jnp.transpose(jnp.concatenate([h_f, h_b], axis=-1), (1, 0, 2))


def init_params(key, in_feature, out_feature):
    """PyTorch-style LSTM init: uniform(-1/sqrt(H), 1/sqrt(H)).

    Weights are stored (in_features, 4H) / (H, 4H) (input-major) with PyTorch
    gate column order [i, f, g, o]; biases are b_ih + b_hh combined, shape (1, 4H).
    """
    H = out_feature
    k = 1.0 / math.sqrt(H)
    ks = jax.random.split(key, 8)
    u = lambda kk, shape: jax.random.uniform(kk, shape, jnp.float32, -k, k)
    return {
        "w_ih_f": u(ks[0], (in_feature, 4 * H)),
        "w_hh_f": u(ks[1], (H, 4 * H)),
        "b_f": u(ks[2], (1, 4 * H)) + u(ks[3], (1, 4 * H)),
        "w_ih_b": u(ks[4], (in_feature, 4 * H)),
        "w_hh_b": u(ks[5], (H, 4 * H)),
        "b_b": u(ks[6], (1, 4 * H)) + u(ks[7], (1, 4 * H)),
    }


if __name__ == "__main__":
    B, L, IN, OUT = 2, 8, 32, 64   # batch, seq_len, in_feature, out_feature

    key = jax.random.PRNGKey(0)
    kx, kp = jax.random.split(key)
    x = jax.random.normal(kx, (B, L, IN), jnp.float32)
    params = init_params(kp, IN, OUT)

    out = bilstm_forward(x, params)
    jax.block_until_ready(out)

    ref = bilstm_reference(x, params)
    assert out.shape == (B, L, 2 * OUT), out.shape
    assert jnp.allclose(out, ref, rtol=1e-4, atol=1e-4), float(
        jnp.max(jnp.abs(out - ref)))

    print("KERNEL_OK")
</pallas_src>

<mosaic_0001>
module attributes {stable_mosaic.version = 11 : i64} {
  func.func @bilstm_kernel(%arg0: memref<64x32xf32, #tpu.memory_space<vmem>>, %arg1: memref<32x256xf32, #tpu.memory_space<vmem>>, %arg2: memref<64x256xf32, #tpu.memory_space<vmem>>, %arg3: memref<1x256xf32, #tpu.memory_space<vmem>>, %arg4: memref<32x256xf32, #tpu.memory_space<vmem>>, %arg5: memref<64x256xf32, #tpu.memory_space<vmem>>, %arg6: memref<1x256xf32, #tpu.memory_space<vmem>>, %arg7: memref<64x128xf32, #tpu.memory_space<vmem>>, %arg8: memref<64x256xf32, #tpu.memory_space<vmem>>, %arg9: memref<64x256xf32, #tpu.memory_space<vmem>>, %arg10: memref<64x64xf32, #tpu.memory_space<vmem>>, %arg11: memref<64x64xf32, #tpu.memory_space<vmem>>) attributes {dimension_semantics = [], scalar_prefetch = 0 : i64, scratch_operands = 4 : i64, tpu.core_type = #tpu.core_type<tc>} {
    %c0 = arith.constant 0 : index
    %c0_0 = arith.constant 0 : index
    %0 = vector.load %arg0[%c0, %c0_0] : memref<64x32xf32, #tpu.memory_space<vmem>>, vector<64x32xf32>
    %c0_1 = arith.constant 0 : index
    %c0_2 = arith.constant 0 : index
    %1 = vector.load %arg1[%c0_1, %c0_2] : memref<32x256xf32, #tpu.memory_space<vmem>>, vector<32x256xf32>
    %cst = arith.constant dense<0.000000e+00> : vector<64x256xf32>
    %2 = tpu.matmul %0, %1, %cst {dimension_numbers = #tpu.dot_dimension_numbers<[1], [0], [0], [1], [0, 0, 1, 1], [], []>, precision = #tpu.contract_precision<fp32>} : vector<64x32xf32>, vector<32x256xf32>, vector<64x256xf32> -> vector<64x256xf32>
    %c0_3 = arith.constant 0 : index
    %c0_4 = arith.constant 0 : index
    %3 = vector.load %arg3[%c0_3, %c0_4] : memref<1x256xf32, #tpu.memory_space<vmem>>, vector<1x256xf32>
    %4 = vector.broadcast %3 : vector<1x256xf32> to vector<64x256xf32>
    %5 = arith.addf %2, %4 : vector<64x256xf32>
    %c0_5 = arith.constant 0 : index
    %c0_6 = arith.constant 0 : index
    %6 = vector.load %arg8[%c0_5, %c0_6] : memref<64x256xf32, #tpu.memory_space<vmem>>, vector<64x256xf32>
    tpu.vector_store %arg8[%c0_5, %c0_6], %5 {strides = array<i32>} : memref<64x256xf32, #tpu.memory_space<vmem>>, vector<64x256xf32>,
    %c0_7 = arith.constant 0 : index
    %c0_8 = arith.constant 0 : index
    %7 = vector.load %arg4[%c0_7, %c0_8] : memref<32x256xf32, #tpu.memory_space<vmem>>, vector<32x256xf32>
    %cst_9 = arith.constant dense<0.000000e+00> : vector<64x256xf32>
    %8 = tpu.matmul %0, %7, %cst_9 {dimension_numbers = #tpu.dot_dimension_numbers<[1], [0], [0], [1], [0, 0, 1, 1], [], []>, precision = #tpu.contract_precision<fp32>} : vector<64x32xf32>, vector<32x256xf32>, vector<64x256xf32> -> vector<64x256xf32>
    %c0_10 = arith.constant 0 : index
    %c0_11 = arith.constant 0 : index
    %9 = vector.load %arg6[%c0_10, %c0_11] : memref<1x256xf32, #tpu.memory_space<vmem>>, vector<1x256xf32>
    %10 = vector.broadcast %9 : vector<1x256xf32> to vector<64x256xf32>
    %11 = arith.addf %8, %10 : vector<64x256xf32>
    %c0_12 = arith.constant 0 : index
    %c0_13 = arith.constant 0 : index
    %12 = vector.load %arg9[%c0_12, %c0_13] : memref<64x256xf32, #tpu.memory_space<vmem>>, vector<64x256xf32>
    tpu.vector_store %arg9[%c0_12, %c0_13], %11 {strides = array<i32>} : memref<64x256xf32, #tpu.memory_space<vmem>>, vector<64x256xf32>,
    %c0_14 = arith.constant 0 : index
    %c0_15 = arith.constant 0 : index
    %13 = vector.load %arg2[%c0_14, %c0_15] : memref<64x256xf32, #tpu.memory_space<vmem>>, vector<64x256xf32>
    %c0_16 = arith.constant 0 : index
    %c0_17 = arith.constant 0 : index
    %14 = vector.load %arg5[%c0_16, %c0_17] : memref<64x256xf32, #tpu.memory_space<vmem>>, vector<64x256xf32>
    %cst_18 = arith.constant 0.000000e+00 : f32
    %15 = vector.broadcast %cst_18 : f32 to vector<8x64xf32>
    %c0_i32 = arith.constant 0 : i32
    %c8_i32 = arith.constant 8 : i32
    %16 = arith.addi %c0_i32, %c8_i32 : i32
    %c1_i32 = arith.constant 1 : i32
    %17:4 = scf.for %arg12 = %c0_i32 to %16 step %c1_i32 iter_args(%arg13 = %15, %arg14 = %15, %arg15 = %15, %arg16 = %15) -> (vector<8x64xf32>, vector<8x64xf32>, vector<8x64xf32>, vector<8x64xf32>)  : i32 {
      %c8_i32_26 = arith.constant 8 : i32
      %22 = arith.muli %arg12, %c8_i32_26 : i32
      %23 = tpu.assume_multiple %22, 8 : i32
      %24 = arith.index_cast %23 : i32 to index
      %c0_27 = arith.constant 0 : index
      %25 = vector.load %arg8[%24, %c0_27] : memref<64x256xf32, #tpu.memory_space<vmem>>, vector<8x256xf32>
      %cst_28 = arith.constant dense<0.000000e+00> : vector<8x256xf32>
      %26 = tpu.matmul %arg13, %13, %cst_28 {dimension_numbers = #tpu.dot_dimension_numbers<[1], [0], [0], [1], [0, 0, 1, 1], [], []>, precision = #tpu.contract_precision<fp32>} : vector<8x64xf32>, vector<64x256xf32>, vector<8x256xf32> -> vector<8x256xf32>
      %27 = arith.addf %25, %26 : vector<8x256xf32>
      %28 = vector.extract_strided_slice %27 {offsets = [0, 0], sizes = [8, 64], strides = [1, 1]} : vector<8x256xf32> to vector<8x64xf32>
      %cst_29 = arith.constant 0.000000e+00 : f32
      %29 = vector.broadcast %cst_29 : f32 to vector<8x64xf32>
      %30 = arith.subf %29, %28 : vector<8x64xf32>
      %31 = math.exp %30 : vector<8x64xf32>
      %cst_30 = arith.constant 1.000000e+00 : f32
      %32 = vector.broadcast %cst_30 : f32 to vector<8x64xf32>
      %33 = arith.addf %32, %31 : vector<8x64xf32>
      %cst_31 = arith.constant 1.000000e+00 : f32
      %34 = vector.broadcast %cst_31 : f32 to vector<8x64xf32>
      %35 = arith.divf %34, %33 : vector<8x64xf32>
      %36 = vector.extract_strided_slice %27 {offsets = [0, 64], sizes = [8, 64], strides = [1, 1]} : vector<8x256xf32> to vector<8x64xf32>
      %cst_32 = arith.constant 0.000000e+00 : f32
      %37 = vector.broadcast %cst_32 : f32 to vector<8x64xf32>
      %38 = arith.subf %37, %36 : vector<8x64xf32>
      %39 = math.exp %38 : vector<8x64xf32>
      %cst_33 = arith.constant 1.000000e+00 : f32
      %40 = vector.broadcast %cst_33 : f32 to vector<8x64xf32>
      %41 = arith.addf %40, %39 : vector<8x64xf32>
      %cst_34 = arith.constant 1.000000e+00 : f32
      %42 = vector.broadcast %cst_34 : f32 to vector<8x64xf32>
      %43 = arith.divf %42, %41 : vector<8x64xf32>
      %44 = vector.extract_strided_slice %27 {offsets = [0, 128], sizes = [8, 64], strides = [1, 1]} : vector<8x256xf32> to vector<8x64xf32>
      %45 = math.tanh %44 : vector<8x64xf32>
      %46 = vector.extract_strided_slice %27 {offsets = [0, 192], sizes = [8, 64], strides = [1, 1]} : vector<8x256xf32> to vector<8x64xf32>
      %cst_35 = arith.constant 0.000000e+00 : f32
      %47 = vector.broadcast %cst_35 : f32 to vector<8x64xf32>
      %48 = arith.subf %47, %46 : vector<8x64xf32>
      %49 = math.exp %48 : vector<8x64xf32>
      %cst_36 = arith.constant 1.000000e+00 : f32
      %50 = vector.broadcast %cst_36 : f32 to vector<8x64xf32>
      %51 = arith.addf %50, %49 : vector<8x64xf32>
      %cst_37 = arith.constant 1.000000e+00 : f32
      %52 = vector.broadcast %cst_37 : f32 to vector<8x64xf32>
      %53 = arith.divf %52, %51 : vector<8x64xf32>
      %54 = arith.mulf %43, %arg14 : vector<8x64xf32>
      %55 = arith.mulf %35, %45 : vector<8x64xf32>
      %56 = arith.addf %54, %55 : vector<8x64xf32>
      %57 = math.tanh %56 : vector<8x64xf32>
      %58 = arith.mulf %53, %57 : vector<8x64xf32>
      %59 = arith.index_cast %23 : i32 to index
      %c0_38 = arith.constant 0 : index
      %60 = vector.load %arg10[%59, %c0_38] : memref<64x64xf32, #tpu.memory_space<vmem>>, vector<8x64xf32>
      tpu.vector_store %arg10[%59, %c0_38], %58 {strides = array<i32>} : memref<64x64xf32, #tpu.memory_space<vmem>>, vector<8x64xf32>,
      %c7_i32 = arith.constant 7 : i32
      %61 = arith.subi %c7_i32, %arg12 : i32
      %c8_i32_39 = arith.constant 8 : i32
      %62 = arith.muli %61, %c8_i32_39 : i32
      %63 = tpu.assume_multiple %62, 8 : i32
      %64 = arith.index_cast %63 : i32 to index
      %c0_40 = arith.constant 0 : index
      %65 = vector.load %arg9[%64, %c0_40] : memref<64x256xf32, #tpu.memory_space<vmem>>, vector<8x256xf32>
      %cst_41 = arith.constant dense<0.000000e+00> : vector<8x256xf32>
      %66 = tpu.matmul %arg15, %14, %cst_41 {dimension_numbers = #tpu.dot_dimension_numbers<[1], [0], [0], [1], [0, 0, 1, 1], [], []>, precision = #tpu.contract_precision<fp32>} : vector<8x64xf32>, vector<64x256xf32>, vector<8x256xf32> -> vector<8x256xf32>
      %67 = arith.addf %65, %66 : vector<8x256xf32>
      %68 = vector.extract_strided_slice %67 {offsets = [0, 0], sizes = [8, 64], strides = [1, 1]} : vector<8x256xf32> to vector<8x64xf32>
      %cst_42 = arith.constant 0.000000e+00 : f32
      %69 = vector.broadcast %cst_42 : f32 to vector<8x64xf32>
      %70 = arith.subf %69, %68 : vector<8x64xf32>
      %71 = math.exp %70 : vector<8x64xf32>
      %cst_43 = arith.constant 1.000000e+00 : f32
      %72 = vector.broadcast %cst_43 : f32 to vector<8x64xf32>
      %73 = arith.addf %72, %71 : vector<8x64xf32>
      %cst_44 = arith.constant 1.000000e+00 : f32
      %74 = vector.broadcast %cst_44 : f32 to vector<8x64xf32>
      %75 = arith.divf %74, %73 : vector<8x64xf32>
      %76 = vector.extract_strided_slice %67 {offsets = [0, 64], sizes = [8, 64], strides = [1, 1]} : vector<8x256xf32> to vector<8x64xf32>
      %cst_45 = arith.constant 0.000000e+00 : f32
      %77 = vector.broadcast %cst_45 : f32 to vector<8x64xf32>
      %78 = arith.subf %77, %76 : vector<8x64xf32>
      %79 = math.exp %78 : vector<8x64xf32>
      %cst_46 = arith.constant 1.000000e+00 : f32
      %80 = vector.broadcast %cst_46 : f32 to vector<8x64xf32>
      %81 = arith.addf %80, %79 : vector<8x64xf32>
      %cst_47 = arith.constant 1.000000e+00 : f32
      %82 = vector.broadcast %cst_47 : f32 to vector<8x64xf32>
      %83 = arith.divf %82, %81 : vector<8x64xf32>
      %84 = vector.extract_strided_slice %67 {offsets = [0, 128], sizes = [8, 64], strides = [1, 1]} : vector<8x256xf32> to vector<8x64xf32>
      %85 = math.tanh %84 : vector<8x64xf32>
      %86 = vector.extract_strided_slice %67 {offsets = [0, 192], sizes = [8, 64], strides = [1, 1]} : vector<8x256xf32> to vector<8x64xf32>
      %cst_48 = arith.constant 0.000000e+00 : f32
      %87 = vector.broadcast %cst_48 : f32 to vector<8x64xf32>
      %88 = arith.subf %87, %86 : vector<8x64xf32>
      %89 = math.exp %88 : vector<8x64xf32>
      %cst_49 = arith.constant 1.000000e+00 : f32
      %90 = vector.broadcast %cst_49 : f32 to vector<8x64xf32>
      %91 = arith.addf %90, %89 : vector<8x64xf32>
      %cst_50 = arith.constant 1.000000e+00 : f32
      %92 = vector.broadcast %cst_50 : f32 to vector<8x64xf32>
      %93 = arith.divf %92, %91 : vector<8x64xf32>
      %94 = arith.mulf %83, %arg16 : vector<8x64xf32>
      %95 = arith.mulf %75, %85 : vector<8x64xf32>
      %96 = arith.addf %94, %95 : vector<8x64xf32>
      %97 = math.tanh %96 : vector<8x64xf32>
      %98 = arith.mulf %93, %97 : vector<8x64xf32>
      %99 = arith.index_cast %63 : i32 to index
      %c0_51 = arith.constant 0 : index
      %100 = vector.load %arg11[%99, %c0_51] : memref<64x64xf32, #tpu.memory_space<vmem>>, vector<8x64xf32>
      tpu.vector_store %arg11[%99, %c0_51], %98 {strides = array<i32>} : memref<64x64xf32, #tpu.memory_space<vmem>>, vector<8x64xf32>,
      scf.yield %58, %56, %98, %96 : vector<8x64xf32>, vector<8x64xf32>, vector<8x64xf32>, vector<8x64xf32>
    }
    %c8_i32_19 = arith.constant 8 : i32
    %c0_20 = arith.constant 0 : index
    %c0_21 = arith.constant 0 : index
    %18 = vector.load %arg10[%c0_20, %c0_21] : memref<64x64xf32, #tpu.memory_space<vmem>>, vector<64x64xf32>
    %c0_22 = arith.constant 0 : index
    %c0_23 = arith.constant 0 : index
    %19 = vector.load %arg11[%c0_22, %c0_23] : memref<64x64xf32, #tpu.memory_space<vmem>>, vector<64x64xf32>
    %20 = tpu.concatenate %18, %19 in 1 : vector<64x64xf32>, vector<64x64xf32> -> vector<64x128xf32>
    %c0_24 = arith.constant 0 : index
    %c0_25 = arith.constant 0 : index
    %21 = vector.load %arg7[%c0_24, %c0_25] : memref<64x128xf32, #tpu.memory_space<vmem>>, vector<64x128xf32>
    tpu.vector_store %arg7[%c0_24, %c0_25], %20 {strides = array<i32>} : memref<64x128xf32, #tpu.memory_space<vmem>>, vector<64x128xf32>,
    return
  }
}

</mosaic_0001>

<bundles_post_ra>
// kernel: tpu_custom_call.1
= control target key start
LH: loop header
LB: loop body
LE: loop exit
PB: predicated region body
PF: predicated region fallthrough
CT: control target
= control target key end

     0   :  { %12 = vsyncpa [#allocation7], 0  ;;  %s5573_s0 = inlined_call_operand.vmem [shape: f32[64,32], index: 0, kind: input, shape index: {}]   ;;  %s5574_s1 = inlined_call_operand.vmem [shape: f32[32,256], index: 1, kind: input, shape index: {}]   ;;  %s5575_s2 = inlined_call_operand.hbm [shape: f32[64,256], index: 2, kind: input, shape index: {}]   ;;  %s5576_s3 = inlined_call_operand.vmem [shape: f32[1,256], index: 3, kind: input, shape index: {}]   ;;  %s5577_s4 = inlined_call_operand.hbm [shape: f32[32,256], index: 4, kind: input, shape index: {}]   ;;  %s5578_s5 = inlined_call_operand.hbm [shape: f32[64,256], index: 5, kind: input, shape index: {}]   ;;  %s5579_s6 = inlined_call_operand.vmem [shape: f32[1,256], index: 6, kind: input, shape index: {}]   ;;  %s5580_s7 = inlined_call_operand.hbm [shape: f32[64,128], index: 7, kind: output, shape index: {}]  }
   0x1   :  { %13 = vsyncpa [#allocation10], 0 }
   0x2   :  { %14 = vsyncpa [#allocation8], 0  ;;  %s4195_s24 = smov [#allocation9]   ;;  %s4196_s26 = smov [#allocation6]  }
   0x3   :  { %s38_s25 = sshll.u32 %s4195_s24, 4  ;;  %s24_s27 = sshll.u32 %s4196_s26, 4  ;;  %s39_s25 = int_to_ptr.vmem [resolvable:$true] %s38_s25  ;;  %s4247_s27 = int_to_ptr.vmem [resolvable:$true] %s24_s27 }
   0x4   :  { %s4061_s30 = scalar_lea.hbm %s5577_s4, 1024 }
   0x5   :  { %p4062_p0 = scmp.ne.s32.totalorder %s5577_s4, %s4061_s30  ;;  %p4065_p1 = scmp.lt.u32.totalorder %s4061_s30, %s5577_s4 }
   0x7   :  { %p4067_p2 = pnand %p4065_p1, %p4062_p0 }
   0x9   :  { %4070 = shalt.err (!%p4067_p2)
}
   0xa   :  { %s4071_s12 = scalar_lea.vmem %s39_s25, 1024  ;;  %p4076_p4 = scmp.lt.s32.totalorder %s39_s25, %s39_s25 }
   0xb   :  { %p4072_p3 = scmp.ne.s32.totalorder %s39_s25, %s4071_s12  ;;  %p4077_p5 = scmp.lt.s32.totalorder %s4071_s12, %s4071_s12 }
   0xd   :  { %p4078_p6 = por %p4077_p5, %p4076_p4 }
   0xf   :  { %p4079_p7 = pnand %p4078_p6, %p4072_p3 }
  0x11   :  { %4082 = shalt.err (!%p4079_p7)
}
  0x12   :  { %s4197_s13 = smov 256   ;;  %s4198_s14 = smov 16  }
  0x13   :  { %44 = dma.hbm_to_vmem [thread:$0]  %s5577_s4, 1024, %s39_s25, [#allocation10], %s4197_s13, %s4197_s13, %s4198_s14  }
  0x14   :  { %s4083_s19 = scalar_lea.hbm %s5575_s2, 2048 }
  0x15   :  { %p4084_p8 = scmp.ne.s32.totalorder %s5575_s2, %s4083_s19  ;;  %p4087_p9 = scmp.lt.u32.totalorder %s4083_s19, %s5575_s2 }
  0x17   :  { %p4089_p10 = pnand %p4087_p9, %p4084_p8 }
  0x19   :  { %4092 = shalt.err (!%p4089_p10)
}
  0x1a   :  { %s4093_s24 = scalar_lea.vmem %s4247_s27, 2048  ;;  %p4098_p12 = scmp.lt.s32.totalorder %s4247_s27, %s4247_s27 }
  0x1b   :  { %p4094_p11 = scmp.ne.s32.totalorder %s4247_s27, %s4093_s24  ;;  %p4099_p13 = scmp.lt.s32.totalorder %s4093_s24, %s4093_s24 }
  0x1d   :  { %p4100_p0 = por %p4099_p13, %p4098_p12 }
  0x1f   :  { %p4101_p1 = pnand %p4100_p0, %p4094_p11 }
  0x21   :  { %4104 = shalt.err (!%p4101_p1)
}
  0x22   :  { %30 = dma.hbm_to_vmem [thread:$0]  %s5575_s2, 2048, %s4247_s27, [#allocation7], %s4197_s13, %s4197_s13, %s4198_s14  }
  0x23   :  { %s4199_s26 = smov [#allocation11]   ;;  %s4105_s8 = scalar_lea.hbm %s5578_s5, 2048 }
  0x24   :  { %s50_s28 = sshll.u32 %s4199_s26, 4  ;;  %p4106_p2 = scmp.ne.s32.totalorder %s5578_s5, %s4105_s8  ;;  %s51_s28 = int_to_ptr.vmem [resolvable:$true] %s50_s28 }
  0x25   :  { %p4109_p3 = scmp.lt.u32.totalorder %s4105_s8, %s5578_s5 }
  0x27   :  { %p4111_p4 = pnand %p4109_p3, %p4106_p2 }
  0x29   :  { %4114 = shalt.err (!%p4111_p4)
}
  0x2a   :  { %s4115_s15 = scalar_lea.vmem %s51_s28, 2048  ;;  %p4120_p6 = scmp.lt.s32.totalorder %s51_s28, %s51_s28 }
  0x2b   :  { %p4116_p5 = scmp.ne.s32.totalorder %s51_s28, %s4115_s15  ;;  %p4121_p7 = scmp.lt.s32.totalorder %s4115_s15, %s4115_s15 }
  0x2d   :  { %p4122_p8 = por %p4121_p7, %p4120_p6 }
  0x2f   :  { %p4123_p9 = pnand %p4122_p8, %p4116_p5 }
  0x31   :  { %4126 = shalt.err (!%p4123_p9)
}
  0x32   :  { %56 = dma.hbm_to_vmem [thread:$0]  %s5578_s5, 2048, %s51_s28, [#allocation10], %s4197_s13, %s4197_s13, %s4198_s14  }
  0x33   :  { %4169 = dma.done.wait [#allocation7], 2048  }
  0x34   :  { %4170 = vsyncadd [#allocation7], 4294965248 }
  0x35   :  { %4171 = dma.done.wait [#allocation10], 3072  }
  0x36   :  { %4172 = vsyncadd [#allocation10], 4294964224  ;;  %v5581_v0 = vmov 0.0   ;;  %v4301_v1 = vld [vmem:[#allocation6] sm:$0xff]  ;;  %v4303_v2 = vld [vmem:[#allocation6 + $0x8] sm:$0xff]  ;;  %vm96_vm0 = vcmask 261120  }
  0x37   :  { %193 = vmatprep.mubr.f32.mxu0 %v5581_v0  ;;  %1115 = vmatprep.mubr.f32.mxu1 %v5581_v0  ;;  %5717 = vst [vmem:[#allocation16_spill] sm:$0xff] %v4301_v1  ;;  %5718 = vst [vmem:[#allocation17_spill] sm:$0xff] %v4303_v2  ;;  %v4305_v3 = vld [vmem:[#allocation6 + $0x10] sm:$0xff]  ;;  %v4307_v4 = vld [vmem:[#allocation6 + $0x18] sm:$0xff] }
  0x38   :  { %5719 = vst [vmem:[#allocation18_spill] sm:$0xff] %v4305_v3  ;;  %5720 = vst [vmem:[#allocation19_spill] sm:$0xff] %v4307_v4  ;;  %v4309_v5 = vld [vmem:[#allocation6 + $0x20] sm:$0xff]  ;;  %v4311_v6 = vld [vmem:[#allocation6 + $0x28] sm:$0xff] }
  0x39   :  { %5721 = vst [vmem:[#allocation20_spill] sm:$0xff] %v4309_v5  ;;  %5722 = vst [vmem:[#allocation21_spill] sm:$0xff] %v4311_v6  ;;  %v4313_v7 = vld [vmem:[#allocation6 + $0x30] sm:$0xff]  ;;  %v4315_v8 = vld [vmem:[#allocation6 + $0x38] sm:$0xff] }
  0x3a   :  { %5723 = vst [vmem:[#allocation22_spill] sm:$0xff] %v4313_v7  ;;  %5724 = vst [vmem:[#allocation23_spill] sm:$0xff] %v4315_v8  ;;  %v4317_v9 = vld [vmem:[#allocation6 + $0x40] sm:$0xff]  ;;  %v4319_v10 = vld [vmem:[#allocation6 + $0x48] sm:$0xff] }
  0x3b   :  { %5725 = vst [vmem:[#allocation24_spill] sm:$0xff] %v4317_v9  ;;  %5726 = vst [vmem:[#allocation25_spill] sm:$0xff] %v4319_v10  ;;  %v4321_v11 = vld [vmem:[#allocation6 + $0x50] sm:$0xff]  ;;  %v4323_v12 = vld [vmem:[#allocation6 + $0x58] sm:$0xff] }
  0x3c   :  { %5727 = vst [vmem:[#allocation26_spill] sm:$0xff] %v4321_v11  ;;  %5728 = vst [vmem:[#allocation27_spill] sm:$0xff] %v4323_v12  ;;  %v4325_v13 = vld [vmem:[#allocation6 + $0x60] sm:$0xff]  ;;  %v4327_v14 = vld [vmem:[#allocation6 + $0x68] sm:$0xff] }
  0x3d   :  { %5729 = vst [vmem:[#allocation28_spill] sm:$0xff] %v4325_v13  ;;  %5730 = vst [vmem:[#allocation29_spill] sm:$0xff] %v4327_v14  ;;  %v4329_v15 = vld [vmem:[#allocation6 + $0x70] sm:$0xff]  ;;  %v4331_v16 = vld [vmem:[#allocation6 + $0x78] sm:$0xff] }
  0x3e   :  { %5731 = vst [vmem:[#allocation30_spill] sm:$0xff] %v4329_v15  ;;  %5732 = vst [vmem:[#allocation31_spill] sm:$0xff] %v4331_v16  ;;  %v4333_v17 = vld [vmem:[#allocation11] sm:$0xff]  ;;  %v4335_v18 = vld [vmem:[#allocation11 + $0x8] sm:$0xff] }
  0x3f   :  { %5733 = vst [vmem:[#allocation32_spill] sm:$0xff] %v4333_v17  ;;  %5734 = vst [vmem:[#allocation33_spill] sm:$0xff] %v4335_v18  ;;  %v4337_v19 = vld [vmem:[#allocation11 + $0x10] sm:$0xff]  ;;  %v4339_v20 = vld [vmem:[#allocation11 + $0x18] sm:$0xff] }
  0x40   :  { %5735 = vst [vmem:[#allocation34_spill] sm:$0xff] %v4337_v19  ;;  %5736 = vst [vmem:[#allocation35_spill] sm:$0xff] %v4339_v20  ;;  %v4341_v21 = vld [vmem:[#allocation11 + $0x20] sm:$0xff]  ;;  %v4343_v22 = vld [vmem:[#allocation11 + $0x28] sm:$0xff] }
  0x41   :  { %5737 = vst [vmem:[#allocation36_spill] sm:$0xff] %v4341_v21  ;;  %5738 = vst [vmem:[#allocation37_spill] sm:$0xff] %v4343_v22  ;;  %v4345_v23 = vld [vmem:[#allocation11 + $0x30] sm:$0xff]  ;;  %v4347_v24 = vld [vmem:[#allocation11 + $0x38] sm:$0xff] }
  0x42   :  { %5739 = vst [vmem:[#allocation38_spill] sm:$0xff] %v4345_v23  ;;  %5740 = vst [vmem:[#allocation39_spill] sm:$0xff] %v4347_v24  ;;  %v4349_v25 = vld [vmem:[#allocation11 + $0x40] sm:$0xff]  ;;  %v4351_v26 = vld [vmem:[#allocation11 + $0x48] sm:$0xff] }
  0x43   :  { %5741 = vst [vmem:[#allocation40_spill] sm:$0xff] %v4349_v25  ;;  %5742 = vst [vmem:[#allocation41_spill] sm:$0xff] %v4351_v26  ;;  %v4353_v27 = vld [vmem:[#allocation11 + $0x50] sm:$0xff]  ;;  %v4355_v28 = vld [vmem:[#allocation11 + $0x58] sm:$0xff] }
  0x44   :  { %5743 = vst [vmem:[#allocation42_spill] sm:$0xff] %v4353_v27  ;;  %5744 = vst [vmem:[#allocation43_spill] sm:$0xff] %v4355_v28  ;;  %v4357_v29 = vld [vmem:[#allocation11 + $0x60] sm:$0xff]  ;;  %v4359_v30 = vld [vmem:[#allocation11 + $0x68] sm:$0xff] }
  0x45   :  { %5745 = vst [vmem:[#allocation44_spill] sm:$0xff] %v4357_v29  ;;  %5746 = vst [vmem:[#allocation45_spill] sm:$0xff] %v4359_v30  ;;  %v4361_v31 = vld [vmem:[#allocation11 + $0x70] sm:$0xff]  ;;  %v4363_v32 = vld [vmem:[#allocation11 + $0x78] sm:$0xff] }
  0x46   :  { %5747 = vst [vmem:[#allocation46_spill] sm:$0xff] %v4361_v31  ;;  %5748 = vst [vmem:[#allocation47_spill] sm:$0xff] %v4363_v32  ;;  %v77_v33 = vld [vmem:[%s5574_s1 + $0x8] sm:$0xff]  ;;  %v79_v34 = vld [vmem:[%s5574_s1 + $0x18] sm:$0xff] }
  0x47   :  { %v121_v35 = vand.u32 4294901760, %v77_v33  ;;  %v1024_v36 = vld [vmem:[#allocation9 + $0x8] sm:$0xff]  ;;  %v1026_v37 = vld [vmem:[#allocation9 + $0x18] sm:$0xff]  ;;  %v125_v38 = vand.u32 4294901760, %v79_v34  ;;  %v76_v41 = vld [vmem:[%s5574_s1] sm:$0xff] }
  0x48   :  { %v1043_v39 = vand.u32 4294901760, %v1024_v36  ;;  %v1047_v40 = vand.u32 4294901760, %v1026_v37  ;;  %v78_v42 = vld [vmem:[%s5574_s1 + $0x10] sm:$0xff]  ;;  %v1023_v43 = vld [vmem:[#allocation9] sm:$0xff]  ;;  %v123_v45 = vand.u32 4294901760, %v76_v41  ;;  %v81_v49 = vld [vmem:[%s5574_s1 + $0x28] sm:$0xff] }
  0x49   :  { %v4377_v44 = vsub.f32 %v77_v33, %v121_v35  ;;  %v127_v46 = vand.u32 4294901760, %v78_v42  ;;  %v1025_v47 = vld [vmem:[#allocation9 + $0x10] sm:$0xff]  ;;  %v1045_v48 = vand.u32 4294901760, %v1023_v43  ;;  %v83_v50 = vld [vmem:[%s5574_s1 + $0x38] sm:$0xff]  ;;  %v4385_v51 = vpack.c.bf16 %v125_v38, %v121_v35  ;;  %v1028_v55 = vld [vmem:[#allocation9 + $0x28] sm:$0xff] }
  0x4a   :  { %v4387_v52 = vsub.f32 %v79_v34, %v125_v38  ;;  %v4389_v53 = vpack.c.bf16 %v1047_v40, %v1043_v39  ;;  %v4391_v54 = vsub.f32 %v1024_v36, %v1043_v39  ;;  %v1030_v56 = vld [vmem:[#allocation9 + $0x38] sm:$0xff]  ;;  %v80_v57 = vld [vmem:[%s5574_s1 + $0x20] sm:$0xff]  ;;  %v4396_v58 = vsub.f32 %v1026_v37, %v1047_v40  ;;  %v82_v62 = vld [vmem:[%s5574_s1 + $0x30] sm:$0xff] }
  0x4b   :  { %v4398_v59 = vpack.c.bf16 %v127_v46, %v123_v45  ;;  %v4400_v60 = vsub.f32 %v76_v41, %v123_v45  ;;  %v4402_v61 = vsub.f32 %v78_v42, %v127_v46  ;;  %3486 = vmatprep.subr.bf16.mxu0 %v4385_v51  ;;  %v1049_v63 = vand.u32 4294901760, %v1025_v47  ;;  %v1027_v40 = vld [vmem:[#allocation9 + $0x20] sm:$0xff]  ;;  %v1029_v0 = vld [vmem:[#allocation9 + $0x30] sm:$0xff] }
  0x4c   :  { %3534 = vmatprep.subr.bf16.mxu1 %v4389_v53  ;;  %v4409_v33 = vsub.f32 %v1023_v43, %v1045_v48  ;;  %v129_v34 = vand.u32 4294901760, %v81_v49  ;;  %v133_v35 = vand.u32 4294901760, %v83_v50  ;;  %v1051_v36 = vand.u32 4294901760, %v1028_v55  ;;  %v68_v43 = vld [vmem:[%s5573_s0] sm:$0xff] }
  0x4d   :  { %3488 = vmatpush1.bf16.msra.mxu0 %v4398_v59  ;;  %v1055_v37 = vand.u32 4294901760, %v1030_v56  ;;  %v131_v38 = vand.u32 4294901760, %v80_v57  ;;  %v135_v39 = vand.u32 4294901760, %v82_v62  ;;  %v4412_v41 = vpack.c.bf16 %v1049_v63, %v1045_v48 }
  0x4e   :  { %v4414_v42 = vsub.f32 %v1025_v47, %v1049_v63  ;;  %v4416_v45 = vpack.c.bf16 %v133_v35, %v129_v34  ;;  %v4418_v46 = vsub.f32 %v81_v49, %v129_v34  ;;  %v4423_v31 = vsub.f32 %v83_v50, %v133_v35 }
  0x4f   :  { %v4425_v29 = vpack.c.bf16 %v1055_v37, %v1051_v36  ;;  %v4427_v32 = vsub.f32 %v1028_v55, %v1051_v36  ;;  %v4429_v30 = vsub.f32 %v1030_v56, %v1055_v37  ;;  %3536 = vmatpush1.bf16.msra.mxu1 %v4412_v41  ;;  %v4433_v47 = vpack.c.bf16 %v135_v39, %v131_v38 }
  0x50   :  { %3490 = vmatprep.subr.bf16.mxu0 %v4416_v45  ;;  %v4435_v48 = vsub.f32 %v80_v57, %v131_v38  ;;  %v4437_v49 = vsub.f32 %v82_v62, %v135_v39  ;;  %v1053_v63 = vand.u32 4294901760, %v1027_v40  ;;  %v1057_v50 = vand.u32 4294901760, %v1029_v0 }
  0x51   :  { %3538 = vmatprep.subr.bf16.mxu1 %v4425_v29  ;;  %v98_v34 = vsel %vm96_vm0, %v68_v43, 0  ;;  %v5588_v55 = vand.u32 4294901760, %v4377_v44  ;;  %v5590_v56 = vand.u32 4294901760, %v4387_v52  ;;  %3492 = vmatpush1.bf16.msra.mxu0 %v4433_v47  ;;  %v5591_v57 = vand.u32 4294901760, %v4391_v54 }
  0x52   :  { %v4444_v35 = vsub.f32 %v1027_v40, %v1053_v63  ;;  %v4446_v36 = vand.u32 4294901760, %v98_v34  ;;  %v5594_v62 = vand.u32 4294901760, %v4396_v58  ;;  %v4450_v37 = vpack.c.bf16 %v1057_v50, %v1053_v63 }
  0x53   :  { %v4452_v38 = vsub.f32 %v1029_v0, %v1057_v50  ;;  %v285_v39 = vsub.f32 %v4377_v44, %v5588_v55  ;;  %v297_v43 = vsub.f32 %v4387_v52, %v5590_v56  ;;  %v1207_v27 = vsub.f32 %v4391_v54, %v5591_v57 }
  0x54   :  { %v4461_v40 = vsub.f32 %v98_v34, %v4446_v36  ;;  %v1219_v0 = vsub.f32 %v4396_v58, %v5594_v62  ;;  %v5598_v63 = vand.u32 4294901760, %v4400_v60  ;;  %3540 = vmatpush1.bf16.msra.mxu1 %v4450_v37  ;;  %v5597_v25 = vand.u32 4294901760, %v4402_v61  ;;  %v69_v34 = vld [vmem:[%s5573_s0 + $0x8] sm:$0xff] }
  0x55   :  { %v286_v50 = vand.u32 4294901760, %v285_v39  ;;  %v298_v55 = vand.u32 4294901760, %v297_v43  ;;  %v5599_v56 = vand.u32 4294901760, %v4409_v33  ;;  %v1208_v15 = vand.u32 4294901760, %v1207_v27  ;;  %v70_v27 = vld [vmem:[%s5573_s0 + $0x10] sm:$0xff] }
  0x56   :  { %v4477_v57 = vand.u32 4294901760, %v4461_v40  ;;  %v1220_v13 = vand.u32 4294901760, %v1219_v0  ;;  %v291_v62 = vsub.f32 %v4400_v60, %v5598_v63  ;;  %v303_v39 = vsub.f32 %v4402_v61, %v5597_v25  ;;  %v71_v0 = vld [vmem:[%s5573_s0 + $0x18] sm:$0xff] }
  0x57   :  { %v3493_v28 = vpack.c.bf16 %v298_v55, %v286_v50  ;;  %v1213_v43 = vsub.f32 %v4409_v33, %v5599_v56  ;;  %v72_v55 = vld [vmem:[%s5573_s0 + $0x20] sm:$0xff]  ;;  %v101_v56 = vsel %vm96_vm0, %v69_v34, 0  ;;  %v5749_v14 = vand.u32 4294901760, %v4414_v42 }
  0x58   :  { %v197_v50 = vsub.f32 %v4461_v40, %v4477_v57  ;;  %v3541_v25 = vpack.c.bf16 %v1220_v13, %v1208_v15  ;;  %v292_v63 = vand.u32 4294901760, %v291_v62  ;;  %v304_v26 = vand.u32 4294901760, %v303_v39 }
  0x59   :  { %3494 = vmatprep.subr.bf16.mxu0 %v3493_v28  ;;  %v1214_v16 = vand.u32 4294901760, %v1213_v43  ;;  %v1225_v23 = vsub.f32 %v4414_v42, %v5749_v14  ;;  %v4504_v21 = vand.u32 4294901760, %v101_v56  ;;  %v104_v9 = vsel %vm96_vm0, %v70_v27, 0 }
  0x5a   :  { %v198_v11 = vand.u32 4294901760, %v197_v50  ;;  %3542 = vmatprep.subr.bf16.mxu1 %v3541_v25  ;;  %v107_v24 = vsel %vm96_vm0, %v71_v0, 0  ;;  %v110_v13 = vsel %vm96_vm0, %v72_v55, 0  ;;  %v3495_v15 = vpack.c.bf16 %v304_v26, %v292_v63 }
  0x5b   :  { %v1226_v62 = vand.u32 4294901760, %v1225_v23  ;;  %v4510_v28 = vsub.f32 %v101_v56, %v4504_v21  ;;  %v4512_v34 = vand.u32 4294901760, %v104_v9  ;;  %v4514_v14 = vand.u32 4294901760, %v107_v24 }
  0x5c   :  { %199 = vmatmul.mubr.f32.vlgmr.msra.gmra.mrb[0].mxu0 %v198_v11  ;;  %1121 = vmatmul.mubr.f32.vlgmr.msra.gmra.mrb[0].mxu1 %v198_v11  ;;  %v4516_v39 = vand.u32 4294901760, %v110_v13  ;;  %v5608_v25 = vand.u32 4294901760, %v4418_v46  ;;  %v5607_v43 = vand.u32 4294901760, %v4423_v31  ;;  %v5750_v0 = vmov 0.0  }
  0x5d   :  { %3496 = vmatpush1.bf16.msra.mxu0 %v3495_v15  ;;  %v3543_v27 = vpack.c.bf16 %v1226_v62, %v1214_v16  ;;  %204 = vmatprep.mubr.f32.mxu0 %v5750_v0  ;;  %v4522_v23 = vand.u32 4294901760, %v4510_v28  ;;  %v4525_v26 = vsub.f32 %v104_v9, %v4512_v34  ;;  %v5612_v11 = vand.u32 4294901760, %v4427_v32 }
  0x5e   :  { %1126 = vmatprep.mubr.f32.mxu1 %v5750_v0  ;;  %v4530_v56 = vsub.f32 %v107_v24, %v4514_v14  ;;  %v4533_v63 = vsub.f32 %v110_v13, %v4516_v39  ;;  %v309_v16 = vsub.f32 %v4418_v46, %v5608_v25  ;;  %v321_v55 = vsub.f32 %v4423_v31, %v5607_v43 }
  0x5f   :  { %3544 = vmatpush1.bf16.msra.mxu1 %v3543_v27  ;;  %v208_v9 = vsub.f32 %v4510_v28, %v4522_v23  ;;  %v4544_v50 = vand.u32 4294901760, %v4525_v26  ;;  %v1231_v24 = vsub.f32 %v4427_v32, %v5612_v11  ;;  %v5616_v13 = vand.u32 4294901760, %v4429_v30 }
  0x60   :  { %v4551_v15 = vand.u32 4294901760, %v4530_v56  ;;  %v4554_v62 = vand.u32 4294901760, %v4533_v63  ;;  %v310_v43 = vand.u32 4294901760, %v309_v16  ;;  %v322_v27 = vand.u32 4294901760, %v321_v55  ;;  %v73_v16 = vld [vmem:[%s5573_s0 + $0x28] sm:$0xff] }
  0x61   :  { %v209_v25 = vand.u32 4294901760, %v208_v9  ;;  %v219_v22 = vsub.f32 %v4525_v26, %v4544_v50  ;;  %v1232_v12 = vand.u32 4294901760, %v1231_v24  ;;  %v1243_v10 = vsub.f32 %v4429_v30, %v5616_v13  ;;  %v74_v13 = vld [vmem:[%s5573_s0 + $0x30] sm:$0xff] }
  0x62   :  { %5751 = vst [vmem:[#allocation48_spill] sm:$0xff] %v4551_v15  ;;  %5752 = vst [vmem:[#allocation49_spill] sm:$0xff] %v4554_v62  ;;  %v230_v11 = vsub.f32 %v4530_v56, %v4551_v15  ;;  %v3497_v19 = vpack.c.bf16 %v322_v27, %v310_v43  ;;  %v5623_v17 = vand.u32 4294901760, %v4435_v48  ;;  %v326_v24 = vand.u32 4294901760, %v4437_v49 }
  0x63   :  { %210 = vmatmul.mubr.f32.gmra.mrb[2].mxu0 %v209_v25  ;;  %1132 = vmatmul.mubr.f32.gmra.mrb[2].mxu1 %v209_v25  ;;  %v220_v55 = vand.u32 4294901760, %v219_v22  ;;  %v1244_v9 = vand.u32 4294901760, %v1243_v10  ;;  %v1236_v7 = vand.u32 4294901760, %v4444_v35  ;;  %v241_v27 = vsub.f32 %v4533_v63, %v4554_v62  ;;  %v75_v25 = vld [vmem:[%s5573_s0 + $0x38] sm:$0xff] }
  0x64   :  { %215 = vmatprep.mubr.f32.mxu0 %v5750_v0  ;;  %1137 = vmatprep.mubr.f32.mxu1 %v5750_v0  ;;  %v231_v43 = vand.u32 4294901760, %v230_v11  ;;  %v315_v10 = vsub.f32 %v4435_v48, %v5623_v17  ;;  %v1248_v22 = vand.u32 4294901760, %v4452_v38  ;;  %v327_v20 = vsub.f32 %v4437_v49, %v326_v24 }
  0x65   :  { %3498 = vmatprep.subr.bf16.mxu0 %v3497_v19  ;;  %v3545_v5 = vpack.c.bf16 %v1244_v9, %v1232_v12  ;;  %v1237_v18 = vsub.f32 %v4444_v35, %v1236_v7  ;;  %v113_v11 = vsel %vm96_vm0, %v73_v16, 0  ;;  %v116_v17 = vsel %vm96_vm0, %v74_v13, 0 }
  0x66   :  { %v316_v8 = vand.u32 4294901760, %v315_v10  ;;  %v1249_v6 = vsub.f32 %v4452_v38, %v1248_v22  ;;  %v4587_v3 = vand.u32 4294901760, %v113_v11  ;;  %v328_v1 = vand.u32 4294901760, %v327_v20 }
  0x67   :  { %221 = vmatmul.mubr.f32.gmra.mrb[4].mxu0 %v220_v55  ;;  %1143 = vmatmul.mubr.f32.gmra.mrb[4].mxu1 %v220_v55  ;;  %v1238_v4 = vand.u32 4294901760, %v1237_v18  ;;  %v4590_v2 = vand.u32 4294901760, %v116_v17  ;;  %v119_v12 = vsel %vm96_vm0, %v75_v25, 0  ;;  %v3501_v18 = vpack.c.bf16 %v4387_v52, %v4377_v44 }
  0x68   :  { %226 = vmatprep.mubr.f32.mxu0 %v5750_v0  ;;  %1148 = vmatprep.mubr.f32.mxu1 %v5750_v0  ;;  %v1250_v19 = vand.u32 4294901760, %v1249_v6  ;;  %v4596_v16 = vsub.f32 %v113_v11, %v4587_v3  ;;  %v4598_v9 = vand.u32 4294901760, %v119_v12  ;;  %v3499_v13 = vpack.c.bf16 %v328_v1, %v316_v8 }
  0x69   :  { %3546 = vmatprep.subr.bf16.mxu1 %v3545_v5  ;;  %v4601_v55 = vsub.f32 %v116_v17, %v4590_v2  ;;  %v3549_v6 = vpack.c.bf16 %v4396_v58, %v4391_v54  ;;  %v242_v5 = vand.u32 4294901760, %v241_v27  ;;  %v5753_v8 = vand.u32 4294901760, %v4377_v44 }
  0x6a   :  { %v3547_v20 = vpack.c.bf16 %v1250_v19, %v1238_v4  ;;  %v4606_v10 = vand.u32 4294901760, %v4596_v16  ;;  %v4609_v25 = vsub.f32 %v119_v12, %v4598_v9  ;;  %v5754_v17 = vand.u32 4294901760, %v4387_v52  ;;  %3500 = vmatpush1.bf16.msra.mxu0 %v3499_v13 }
  0x6b   :  { %232 = vmatmul.mubr.f32.gmra.mrb[6].mxu0 %v231_v43  ;;  %1154 = vmatmul.mubr.f32.gmra.mrb[6].mxu1 %v231_v43  ;;  %v4614_v1 = vand.u32 4294901760, %v4601_v55  ;;  %v5755_v43 = vand.u32 4294901760, %v4391_v54  ;;  %v5756_v27 = vand.u32 4294901760, %v4396_v58  ;;  %v5757_v19 = vand.u32 4294901760, %v4400_v60 }
  0x6c   :  { %237 = vmatprep.mubr.f32.mxu0 %v5750_v0  ;;  %1159 = vmatprep.mubr.f32.mxu1 %v5750_v0  ;;  %v252_v4 = vsub.f32 %v4596_v16, %v4606_v10  ;;  %v4624_v11 = vpack.c.bf16 %v5754_v17, %v5753_v8  ;;  %v5758_v62 = vand.u32 4294901760, %v4402_v61  ;;  %v4641_v52 = vand.u32 4294901760, %v4609_v25 }
  0x6d   :  { %3548 = vmatpush1.bf16.msra.mxu1 %v3547_v20  ;;  %v4630_v12 = vpack.c.bf16 %v5756_v27, %v5755_v43  ;;  %v263_v44 = vsub.f32 %v4601_v55, %v4614_v1  ;;  %3502 = vmatprep.subr.bf16.mxu0 %v3501_v18  ;;  %v5759_v54 = vand.u32 4294901760, %v4409_v33  ;;  %v5760_v58 = vand.u32 4294901760, %v4414_v42 }
  0x6e   :  { %v4636_v15 = vpack.c.bf16 %v5758_v62, %v5757_v19  ;;  %3550 = vmatprep.subr.bf16.mxu1 %v3549_v6  ;;  %v5761_v20 = vand.u32 4294901760, %v4418_v46  ;;  %v5762_v8 = vand.u32 4294901760, %v4423_v31  ;;  %v253_v17 = vand.u32 4294901760, %v252_v4 }
  0x6f   :  { %v4647_v13 = vpack.c.bf16 %v5760_v58, %v5759_v54  ;;  %243 = vmatmul.mubr.f32.gmra.mrb[8].mxu0 %v242_v5  ;;  %1165 = vmatmul.mubr.f32.gmra.mrb[8].mxu1 %v242_v5  ;;  %v5763_v43 = vand.u32 4294901760, %v4427_v32  ;;  %v5764_v18 = vand.u32 4294901760, %v4429_v30  ;;  %v5765_v27 = vand.u32 4294901760, %v4435_v48 }
  0x70   :  { %v4653_v62 = vpack.c.bf16 %v5762_v8, %v5761_v20  ;;  %v4665_v54 = vpack.c.bf16 %v1248_v22, %v1236_v7  ;;  %248 = vmatprep.mubr.f32.mxu0 %v5750_v0  ;;  %1170 = vmatprep.mubr.f32.mxu1 %v5750_v0  ;;  %v264_v5 = vand.u32 4294901760, %v263_v44  ;;  %v274_v4 = vsub.f32 %v4609_v25, %v4641_v52 }
  0x71   :  { %v4659_v6 = vpack.c.bf16 %v5764_v18, %v5763_v43  ;;  %v4663_v19 = vpack.c.bf16 %v326_v24, %v5765_v27  ;;  %v3503_v7 = vpack.c.bf16 %v4402_v61, %v4400_v60  ;;  %v3551_v22 = vpack.c.bf16 %v4414_v42, %v4409_v33 }
  0x72   :  { %v275_v24 = vand.u32 4294901760, %v274_v4  ;;  %v3505_v44 = vpack.c.bf16 %v4423_v31, %v4418_v46  ;;  %v3553_v58 = vpack.c.bf16 %v4429_v30, %v4427_v32  ;;  %v3507_v60 = vpack.c.bf16 %v4437_v49, %v4435_v48  ;;  %v5766_v30 = vld [vmem:[#allocation48_spill] sm:$0xff]  ;;  %v5767_v31 = vld [vmem:[#allocation49_spill] sm:$0xff] }
  0x73   :  { %254 = vmatmul.mubr.f32.gmra.mrb[10].mxu0 %v253_v17  ;;  %1176 = vmatmul.mubr.f32.gmra.mrb[10].mxu1 %v253_v17  ;;  %v3555_v61 = vpack.c.bf16 %v4452_v38, %v4444_v35 }
  0x74   :  { %259 = vmatprep.mubr.f32.mxu0 %v5750_v0  ;;  %1181 = vmatprep.mubr.f32.mxu1 %v5750_v0 }
  0x77   :  { %265 = vmatmul.mubr.f32.gmra.mrb[12].mxu0 %v264_v5  ;;  %1187 = vmatmul.mubr.f32.gmra.mrb[12].mxu1 %v264_v5 }
  0x78   :  { %270 = vmatprep.mubr.f32.mxu0 %v5750_v0  ;;  %1192 = vmatprep.mubr.f32.mxu1 %v5750_v0 }
  0x7b   :  { %276 = vmatmul.mubr.f32.gmra.mrb[14].mxu0 %v275_v24  ;;  %1198 = vmatmul.mubr.f32.gmra.mrb[14].mxu1 %v275_v24 }
  0x7c   :  { %386 = vmatprep.mubr.f32.mxu0 %v5750_v0  ;;  %1308 = vmatprep.mubr.f32.mxu1 %v5750_v0 }
  0x7f   :  { %388 = vmatmul.mubr.f32.vlgmr.msra.gmra.mrb[0].mxu0 %v4446_v36  ;;  %1310 = vmatmul.mubr.f32.vlgmr.msra.gmra.mrb[0].mxu1 %v4446_v36 }
  0x80   :  { %3504 = vmatpush1.bf16.msra.mxu0 %v3503_v7  ;;  %3552 = vmatpush1.bf16.msra.mxu1 %v3551_v22 }
  0x81   :  { %393 = vmatprep.mubr.f32.mxu0 %v5750_v0  ;;  %1315 = vmatprep.mubr.f32.mxu1 %v5750_v0 }
  0x82   :  { %3506 = vmatprep.subr.bf16.mxu0 %v3505_v44  ;;  %3554 = vmatprep.subr.bf16.mxu1 %v3553_v58 }
  0x83   :  { %395 = vmatmul.mubr.f32.gmra.mrb[2].mxu0 %v4504_v21  ;;  %1317 = vmatmul.mubr.f32.gmra.mrb[2].mxu1 %v4504_v21 }
  0x84   :  { %400 = vmatprep.mubr.f32.mxu0 %v5750_v0  ;;  %1322 = vmatprep.mubr.f32.mxu1 %v5750_v0 }
  0x85   :  { %3508 = vmatpush1.bf16.msra.mxu0 %v3507_v60  ;;  %3556 = vmatpush1.bf16.msra.mxu1 %v3555_v61 }
  0x86   :  { %3510 = vmatprep.subr.bf16.mxu0 %v4385_v51  ;;  %3558 = vmatprep.subr.bf16.mxu1 %v4389_v53 }
  0x87   :  { %402 = vmatmul.mubr.f32.gmra.mrb[4].mxu0 %v4512_v34  ;;  %1324 = vmatmul.mubr.f32.gmra.mrb[4].mxu1 %v4512_v34 }
  0x88   :  { %407 = vmatprep.mubr.f32.mxu0 %v5750_v0  ;;  %1329 = vmatprep.mubr.f32.mxu1 %v5750_v0 }
  0x8b   :  { %409 = vmatmul.mubr.f32.gmra.mrb[6].mxu0 %v4514_v14  ;;  %1331 = vmatmul.mubr.f32.gmra.mrb[6].mxu1 %v4514_v14 }
  0x8c   :  { %414 = vmatprep.mubr.f32.mxu0 %v5750_v0  ;;  %1336 = vmatprep.mubr.f32.mxu1 %v5750_v0 }
  0x8f   :  { %416 = vmatmul.mubr.f32.gmra.mrb[8].mxu0 %v4516_v39  ;;  %1338 = vmatmul.mubr.f32.gmra.mrb[8].mxu1 %v4516_v39 }
  0x90   :  { %421 = vmatprep.mubr.f32.mxu0 %v5750_v0  ;;  %1343 = vmatprep.mubr.f32.mxu1 %v5750_v0 }
  0x93   :  { %423 = vmatmul.mubr.f32.gmra.mrb[10].mxu0 %v4587_v3  ;;  %1345 = vmatmul.mubr.f32.gmra.mrb[10].mxu1 %v4587_v3 }
  0x94   :  { %428 = vmatprep.mubr.f32.mxu0 %v5750_v0  ;;  %1350 = vmatprep.mubr.f32.mxu1 %v5750_v0 }
  0x97   :  { %430 = vmatmul.mubr.f32.gmra.mrb[12].mxu0 %v4590_v2  ;;  %1352 = vmatmul.mubr.f32.gmra.mrb[12].mxu1 %v4590_v2 }
  0x98   :  { %435 = vmatprep.mubr.f32.mxu0 %v5750_v0  ;;  %1357 = vmatprep.mubr.f32.mxu1 %v5750_v0 }
  0x9b   :  { %437 = vmatmul.mubr.f32.gmra.mrb[14].mxu0 %v4598_v9  ;;  %1359 = vmatmul.mubr.f32.gmra.mrb[14].mxu1 %v4598_v9 }
  0x9c   :  { %523 = vmatprep.mubr.f32.mxu0 %v5750_v0  ;;  %1445 = vmatprep.mubr.f32.mxu1 %v5750_v0 }
  0x9f   :  { %526 = vmatmul.mubr.f32.vlgmr.msra.gmra.mrb[0].mxu0 %v4461_v40  ;;  %1448 = vmatmul.mubr.f32.vlgmr.msra.gmra.mrb[0].mxu1 %v4461_v40 }
  0xa0   :  { %3512 = vmatpush1.bf16.msra.mxu0 %v4398_v59  ;;  %3560 = vmatpush1.bf16.msra.mxu1 %v4412_v41 }
  0xa1   :  { %531 = vmatprep.mubr.f32.mxu0 %v5750_v0  ;;  %1453 = vmatprep.mubr.f32.mxu1 %v5750_v0 }
  0xa2   :  { %3514 = vmatprep.subr.bf16.mxu0 %v4416_v45  ;;  %3562 = vmatprep.subr.bf16.mxu1 %v4425_v29 }
  0xa3   :  { %534 = vmatmul.mubr.f32.gmra.mrb[2].mxu0 %v4510_v28  ;;  %1456 = vmatmul.mubr.f32.gmra.mrb[2].mxu1 %v4510_v28 }
  0xa4   :  { %539 = vmatprep.mubr.f32.mxu0 %v5750_v0  ;;  %1461 = vmatprep.mubr.f32.mxu1 %v5750_v0 }
  0xa5   :  { %3516 = vmatpush1.bf16.msra.mxu0 %v4433_v47  ;;  %3564 = vmatpush1.bf16.msra.mxu1 %v4450_v37 }
  0xa6   :  { %3518 = vmatprep.subr.bf16.mxu0 %v4624_v11  ;;  %3566 = vmatprep.subr.bf16.mxu1 %v4630_v12 }
  0xa7   :  { %542 = vmatmul.mubr.f32.gmra.mrb[4].mxu0 %v4525_v26  ;;  %1464 = vmatmul.mubr.f32.gmra.mrb[4].mxu1 %v4525_v26 }
  0xa8   :  { %547 = vmatprep.mubr.f32.mxu0 %v5750_v0  ;;  %1469 = vmatprep.mubr.f32.mxu1 %v5750_v0 }
  0xab   :  { %550 = vmatmul.mubr.f32.gmra.mrb[6].mxu0 %v4530_v56  ;;  %1472 = vmatmul.mubr.f32.gmra.mrb[6].mxu1 %v4530_v56 }
  0xac   :  { %555 = vmatprep.mubr.f32.mxu0 %v5750_v0  ;;  %1477 = vmatprep.mubr.f32.mxu1 %v5750_v0 }
  0xaf   :  { %558 = vmatmul.mubr.f32.gmra.mrb[8].mxu0 %v4533_v63  ;;  %1480 = vmatmul.mubr.f32.gmra.mrb[8].mxu1 %v4533_v63 }
  0xb0   :  { %563 = vmatprep.mubr.f32.mxu0 %v5750_v0  ;;  %1485 = vmatprep.mubr.f32.mxu1 %v5750_v0 }
  0xb3   :  { %566 = vmatmul.mubr.f32.gmra.mrb[10].mxu0 %v4596_v16  ;;  %1488 = vmatmul.mubr.f32.gmra.mrb[10].mxu1 %v4596_v16 }
  0xb4   :  { %571 = vmatprep.mubr.f32.mxu0 %v5750_v0  ;;  %1493 = vmatprep.mubr.f32.mxu1 %v5750_v0 }
  0xb7   :  { %574 = vmatmul.mubr.f32.gmra.mrb[12].mxu0 %v4601_v55  ;;  %1496 = vmatmul.mubr.f32.gmra.mrb[12].mxu1 %v4601_v55 }
  0xb8   :  { %579 = vmatprep.mubr.f32.mxu0 %v5750_v0  ;;  %1501 = vmatprep.mubr.f32.mxu1 %v5750_v0 }
  0xbb   :  { %582 = vmatmul.mubr.f32.gmra.mrb[14].mxu0 %v4609_v25  ;;  %1504 = vmatmul.mubr.f32.gmra.mrb[14].mxu1 %v4609_v25 }
  0xbc   :  { %660 = vmatprep.mubr.f32.mxu0 %v5750_v0  ;;  %1582 = vmatprep.mubr.f32.mxu1 %v5750_v0 }
  0xbf   :  { %664 = vmatmul.mubr.f32.vlgmr.msra.gmra.mrb[0].mxu0 %v4477_v57  ;;  %1586 = vmatmul.mubr.f32.vlgmr.msra.gmra.mrb[0].mxu1 %v4477_v57 }
  0xc0   :  { %3520 = vmatpush1.bf16.msra.mxu0 %v4636_v15  ;;  %3568 = vmatpush1.bf16.msra.mxu1 %v4647_v13 }
  0xc1   :  { %669 = vmatprep.mubr.f32.mxu0 %v5750_v0  ;;  %1591 = vmatprep.mubr.f32.mxu1 %v5750_v0 }
  0xc2   :  { %3522 = vmatprep.subr.bf16.mxu0 %v4653_v62  ;;  %3570 = vmatprep.subr.bf16.mxu1 %v4659_v6 }
  0xc3   :  { %673 = vmatmul.mubr.f32.gmra.mrb[2].mxu0 %v4522_v23  ;;  %1595 = vmatmul.mubr.f32.gmra.mrb[2].mxu1 %v4522_v23 }
  0xc4   :  { %678 = vmatprep.mubr.f32.mxu0 %v5750_v0  ;;  %1600 = vmatprep.mubr.f32.mxu1 %v5750_v0 }
  0xc5   :  { %3524 = vmatpush1.bf16.msra.mxu0 %v4663_v19  ;;  %3572 = vmatpush1.bf16.msra.mxu1 %v4665_v54 }
  0xc6   :  { %3526 = vmatprep.subr.bf16.mxu0 %v4385_v51  ;;  %3574 = vmatprep.subr.bf16.mxu1 %v4389_v53  ;;  %v1031_v51 = vld [vmem:[%s5579_s6] sm:$0x3] }
  0xc7   :  { %682 = vmatmul.mubr.f32.gmra.mrb[4].mxu0 %v4544_v50  ;;  %1604 = vmatmul.mubr.f32.gmra.mrb[4].mxu1 %v4544_v50 }
  0xc8   :  { %687 = vmatprep.mubr.f32.mxu0 %v5750_v0  ;;  %1609 = vmatprep.mubr.f32.mxu1 %v5750_v0 }
  0xcb   :  { %691 = vmatmul.mubr.f32.gmra.mrb[6].mxu0 %v5766_v30  ;;  %1613 = vmatmul.mubr.f32.gmra.mrb[6].mxu1 %v5766_v30 }
  0xcc   :  { %696 = vmatprep.mubr.f32.mxu0 %v5750_v0  ;;  %1618 = vmatprep.mubr.f32.mxu1 %v5750_v0 }
  0xcf   :  { %700 = vmatmul.mubr.f32.gmra.mrb[8].mxu0 %v5767_v31  ;;  %1622 = vmatmul.mubr.f32.gmra.mrb[8].mxu1 %v5767_v31 }
  0xd0   :  { %705 = vmatprep.mubr.f32.mxu0 %v5750_v0  ;;  %1627 = vmatprep.mubr.f32.mxu1 %v5750_v0 }
  0xd3   :  { %709 = vmatmul.mubr.f32.gmra.mrb[10].mxu0 %v4606_v10  ;;  %1631 = vmatmul.mubr.f32.gmra.mrb[10].mxu1 %v4606_v10 }
  0xd4   :  { %714 = vmatprep.mubr.f32.mxu0 %v5750_v0  ;;  %1636 = vmatprep.mubr.f32.mxu1 %v5750_v0 }
  0xd7   :  { %718 = vmatmul.mubr.f32.gmra.mrb[12].mxu0 %v4614_v1  ;;  %1640 = vmatmul.mubr.f32.gmra.mrb[12].mxu1 %v4614_v1 }
  0xd8   :  { %723 = vmatprep.mubr.f32.mxu0 %v5750_v0  ;;  %1645 = vmatprep.mubr.f32.mxu1 %v5750_v0 }
  0xdb   :  { %727 = vmatmul.mubr.f32.gmra.mrb[14].mxu0 %v4641_v52  ;;  %1649 = vmatmul.mubr.f32.gmra.mrb[14].mxu1 %v4641_v52 }
  0xdc   :  { %821 = vmatprep.mubr.f32.mxu0 %v5750_v0  ;;  %1743 = vmatprep.mubr.f32.mxu1 %v5750_v0 }
  0xdf   :  { %823 = vmatmul.mubr.f32.vlgmr.msra.gmra.mrb[0].mxu0 %v4446_v36  ;;  %1745 = vmatmul.mubr.f32.vlgmr.msra.gmra.mrb[0].mxu1 %v4446_v36 }
  0xe0   :  { %3528 = vmatpush1.bf16.msra.mxu0 %v4398_v59  ;;  %3576 = vmatpush1.bf16.msra.mxu1 %v4412_v41 }
  0xe1   :  { %828 = vmatprep.mubr.f32.mxu0 %v5750_v0  ;;  %1750 = vmatprep.mubr.f32.mxu1 %v5750_v0 }
  0xe2   :  { %3530 = vmatprep.subr.bf16.mxu0 %v4416_v45  ;;  %3578 = vmatprep.subr.bf16.mxu1 %v4425_v29 }
  0xe3   :  { %830 = vmatmul.mubr.f32.gmra.mrb[2].mxu0 %v4504_v21  ;;  %1752 = vmatmul.mubr.f32.gmra.mrb[2].mxu1 %v4504_v21 }
  0xe4   :  { %835 = vmatprep.mubr.f32.mxu0 %v5750_v0  ;;  %1757 = vmatprep.mubr.f32.mxu1 %v5750_v0 }
  0xe5   :  { %3532 = vmatpush1.bf16.msra.mxu0 %v4433_v47  ;;  %3580 = vmatpush1.bf16.msra.mxu1 %v4450_v37 }
  0xe7   :  { %837 = vmatmul.mubr.f32.gmra.mrb[4].mxu0 %v4512_v34  ;;  %1759 = vmatmul.mubr.f32.gmra.mrb[4].mxu1 %v4512_v34 }
  0xe8   :  { %842 = vmatprep.mubr.f32.mxu0 %v5750_v0  ;;  %1764 = vmatprep.mubr.f32.mxu1 %v5750_v0 }
  0xeb   :  { %844 = vmatmul.mubr.f32.gmra.mrb[6].mxu0 %v4514_v14  ;;  %1766 = vmatmul.mubr.f32.gmra.mrb[6].mxu1 %v4514_v14 }
  0xec   :  { %849 = vmatprep.mubr.f32.mxu0 %v5750_v0  ;;  %1771 = vmatprep.mubr.f32.mxu1 %v5750_v0 }
  0xef   :  { %851 = vmatmul.mubr.f32.gmra.mrb[8].mxu0 %v4516_v39  ;;  %1773 = vmatmul.mubr.f32.gmra.mrb[8].mxu1 %v4516_v39 }
  0xf0   :  { %856 = vmatprep.mubr.f32.mxu0 %v5750_v0  ;;  %1778 = vmatprep.mubr.f32.mxu1 %v5750_v0 }
  0xf3   :  { %858 = vmatmul.mubr.f32.gmra.mrb[10].mxu0 %v4587_v3  ;;  %1780 = vmatmul.mubr.f32.gmra.mrb[10].mxu1 %v4587_v3 }
  0xf4   :  { %863 = vmatprep.mubr.f32.mxu0 %v5750_v0  ;;  %1785 = vmatprep.mubr.f32.mxu1 %v5750_v0 }
  0xf7   :  { %865 = vmatmul.mubr.f32.gmra.mrb[12].mxu0 %v4590_v2  ;;  %1787 = vmatmul.mubr.f32.gmra.mrb[12].mxu1 %v4590_v2 }
  0xf8   :  { %870 = vmatprep.mubr.f32.mxu0 %v5750_v0  ;;  %1792 = vmatprep.mubr.f32.mxu1 %v5750_v0 }
  0xfb   :  { %872 = vmatmul.mubr.f32.gmra.mrb[14].mxu0 %v4598_v9  ;;  %1794 = vmatmul.mubr.f32.gmra.mrb[14].mxu1 %v4598_v9 }
  0xfc   :  { %950 = vmatprep.mubr.f32.mxu0 %v5750_v0  ;;  %1872 = vmatprep.mubr.f32.mxu1 %v5750_v0 }
  0xff   :  { %952 = vmatmul.mubr.f32.vlgmr.msra.gmra.mrb[0].mxu0 %v4446_v36  ;;  %1874 = vmatmul.mubr.f32.vlgmr.msra.gmra.mrb[0].mxu1 %v4446_v36 }
 0x100   :  { %957 = vmatprep.mubr.f32.mxu0 %v5750_v0  ;;  %1879 = vmatprep.mubr.f32.mxu1 %v5750_v0 }
 0x103   :  { %959 = vmatmul.mubr.f32.gmra.mrb[2].mxu0 %v4504_v21  ;;  %1881 = vmatmul.mubr.f32.gmra.mrb[2].mxu1 %v4504_v21  ;;  %v86_v21 = vlaneseq }
 0x104   :  { %964 = vmatprep.mubr.f32.mxu0 %v5750_v0  ;;  %1886 = vmatprep.mubr.f32.mxu1 %v5750_v0 }
 0x105   :  { %v87_v29 = vshrl.u32 %v86_v21, 7 }
 0x107   :  { %966 = vmatmul.mubr.f32.gmra.mrb[4].mxu0 %v4512_v34  ;;  %1888 = vmatmul.mubr.f32.gmra.mrb[4].mxu1 %v4512_v34  ;;  %v88_v32 = vsub.s32 0, %v87_v29 }
 0x108   :  { %971 = vmatprep.mubr.f32.mxu0 %v5750_v0  ;;  %1893 = vmatprep.mubr.f32.mxu1 %v5750_v0 }
 0x109   :  { %v4879_v59 = vrot.slane %v1031_v51, %v88_v32 }
 0x10b   :  { %973 = vmatmul.mubr.f32.gmra.mrb[6].mxu0 %v4514_v14  ;;  %1895 = vmatmul.mubr.f32.gmra.mrb[6].mxu1 %v4514_v14 }
 0x10c   :  { %978 = vmatprep.mubr.f32.mxu0 %v5750_v0  ;;  %1900 = vmatprep.mubr.f32.mxu1 %v5750_v0 }
 0x10f   :  { %980 = vmatmul.mubr.f32.gmra.mrb[8].mxu0 %v4516_v39  ;;  %1902 = vmatmul.mubr.f32.gmra.mrb[8].mxu1 %v4516_v39 }
 0x110   :  { %985 = vmatprep.mubr.f32.mxu0 %v5750_v0  ;;  %1907 = vmatprep.mubr.f32.mxu1 %v5750_v0 }
 0x113   :  { %987 = vmatmul.mubr.f32.gmra.mrb[10].mxu0 %v4587_v3  ;;  %1909 = vmatmul.mubr.f32.gmra.mrb[10].mxu1 %v4587_v3  ;;  %v84_v3 = vld [vmem:[%s5576_s3] sm:$0x3]  ;;  %s4925_s3 = smov 0  }
 0x114   :  { %992 = vmatprep.mubr.f32.mxu0 %v5750_v0  ;;  %1914 = vmatprep.mubr.f32.mxu1 %v5750_v0  ;;  %v4877_v53 = vrot.slane %v84_v3, %v88_v32 }
 0x117   :  { %994 = vmatmul.mubr.f32.gmra.mrb[12].mxu0 %v4590_v2  ;;  %1916 = vmatmul.mubr.f32.gmra.mrb[12].mxu1 %v4590_v2  ;;  %v92_v2 = vsub.s32 1, %v87_v29 }
 0x118   :  { %999 = vmatprep.mubr.f32.mxu0 %v5750_v0  ;;  %1921 = vmatprep.mubr.f32.mxu1 %v5750_v0 }
 0x119   :  { %v4881_v33 = vrot.slane %v84_v3, %v92_v2  ;;  %v4883_v41 = vrot.slane %v1031_v51, %v92_v2 }
 0x11b   :  { %1001 = vmatmul.mubr.f32.gmra.mrb[14].mxu0 %v4598_v9  ;;  %1923 = vmatmul.mubr.f32.gmra.mrb[14].mxu1 %v4598_v9 }
 0x1d2   :  { %v953_v42 = vpop.f32.mrb[0].mxu0  ;;  %v1875_v45 = vpop.f32.mrb[0].mxu1 }
 0x1d3   :  { %v3773_v46 = vadd.f32 %v953_v42, %v4877_v53  ;;  %v3789_v47 = vadd.f32 %v1875_v45, %v4879_v59  ;;  %v955_v48 = vpop.f32.mrb[1].mxu0  ;;  %v1877_v49 = vpop.f32.mrb[1].mxu1 }
 0x1d4   :  { %v3774_v35 = vadd.f32 %v955_v48, %v4881_v33  ;;  %v3790_v36 = vadd.f32 %v1877_v49, %v4883_v41  ;;  %v4917_v48 = vmov 0.0   ;;  %v4919_v49 = vmov 0.0  }
 0x1d5   :  { %1007 = vst [vmem:[#allocation2] sm:$0xff] %v3773_v46  ;;  %1929 = vst [vmem:[#allocation3] sm:$0xff] %v3789_v47 }
 0x1d6   :  { %1008 = vst [vmem:[#allocation2 + $0x8] sm:$0xff] %v3774_v35  ;;  %1930 = vst [vmem:[#allocation3 + $0x8] sm:$0xff] %v3790_v36  ;;  %v960_v57 = vpop.f32.mrb[2].mxu0  ;;  %v1882_v37 = vpop.f32.mrb[2].mxu1  ;;  %v4921_v35 = vmov 0.0   ;;  %v4923_v36 = vmov 0.0  }
 0x1d7   :  { %v3775_v38 = vadd.f32 %v960_v57, %v4877_v53  ;;  %v3791_v40 = vadd.f32 %v1882_v37, %v4879_v59  ;;  %v962_v28 = vpop.f32.mrb[3].mxu0  ;;  %v1884_v34 = vpop.f32.mrb[3].mxu1 }
 0x1d8   :  { %v3776_v14 = vadd.f32 %v962_v28, %v4881_v33  ;;  %v3792_v39 = vadd.f32 %v1884_v34, %v4883_v41 }
 0x1d9   :  { %1009 = vst [vmem:[#allocation2 + $0x10] sm:$0xff] %v3775_v38  ;;  %1931 = vst [vmem:[#allocation3 + $0x10] sm:$0xff] %v3791_v40 }
 0x1da   :  { %1010 = vst [vmem:[#allocation2 + $0x18] sm:$0xff] %v3776_v14  ;;  %1932 = vst [vmem:[#allocation3 + $0x18] sm:$0xff] %v3792_v39  ;;  %v967_v0 = vpop.f32.mrb[4].mxu0  ;;  %v1889_v23 = vpop.f32.mrb[4].mxu1 }
 0x1db   :  { %v3777_v26 = vadd.f32 %v967_v0, %v4877_v53  ;;  %v3793_v56 = vadd.f32 %v1889_v23, %v4879_v59  ;;  %v969_v63 = vpop.f32.mrb[5].mxu0  ;;  %v1891_v50 = vpop.f32.mrb[5].mxu1 }
 0x1dc   :  { %v3778_v15 = vadd.f32 %v969_v63, %v4881_v33  ;;  %v3794_v16 = vadd.f32 %v1891_v50, %v4883_v41 }
 0x1dd   :  { %1011 = vst [vmem:[#allocation2 + $0x20] sm:$0xff] %v3777_v26  ;;  %1933 = vst [vmem:[#allocation3 + $0x20] sm:$0xff] %v3793_v56 }
 0x1de   :  { %1012 = vst [vmem:[#allocation2 + $0x28] sm:$0xff] %v3778_v15  ;;  %1934 = vst [vmem:[#allocation3 + $0x28] sm:$0xff] %v3794_v16  ;;  %v974_v9 = vpop.f32.mrb[6].mxu0  ;;  %v1896_v55 = vpop.f32.mrb[6].mxu1 }
 0x1df   :  { %v3779_v10 = vadd.f32 %v974_v9, %v4877_v53  ;;  %v3795_v25 = vadd.f32 %v1896_v55, %v4879_v59  ;;  %v976_v1 = vpop.f32.mrb[7].mxu0  ;;  %v1898_v11 = vpop.f32.mrb[7].mxu1 }
 0x1e0   :  { %v3780_v12 = vadd.f32 %v976_v1, %v4881_v33  ;;  %v3796_v52 = vadd.f32 %v1898_v11, %v4883_v41 }
 0x1e1   :  { %1013 = vst [vmem:[#allocation2 + $0x30] sm:$0xff] %v3779_v10  ;;  %1935 = vst [vmem:[#allocation3 + $0x30] sm:$0xff] %v3795_v25 }
 0x1e2   :  { %1014 = vst [vmem:[#allocation2 + $0x38] sm:$0xff] %v3780_v12  ;;  %1936 = vst [vmem:[#allocation3 + $0x38] sm:$0xff] %v3796_v52  ;;  %v981_v13 = vpop.f32.mrb[8].mxu0  ;;  %v1903_v20 = vpop.f32.mrb[8].mxu1 }
 0x1e3   :  { %v3781_v8 = vadd.f32 %v981_v13, %v4877_v53  ;;  %v3797_v62 = vadd.f32 %v1903_v20, %v4879_v59  ;;  %v983_v17 = vpop.f32.mrb[9].mxu0  ;;  %v1905_v43 = vpop.f32.mrb[9].mxu1 }
 0x1e4   :  { %v3782_v18 = vadd.f32 %v983_v17, %v4881_v33  ;;  %v3798_v6 = vadd.f32 %v1905_v43, %v4883_v41 }
 0x1e5   :  { %1015 = vst [vmem:[#allocation2 + $0x40] sm:$0xff] %v3781_v8  ;;  %1937 = vst [vmem:[#allocation3 + $0x40] sm:$0xff] %v3797_v62 }
 0x1e6   :  { %1016 = vst [vmem:[#allocation2 + $0x48] sm:$0xff] %v3782_v18  ;;  %1938 = vst [vmem:[#allocation3 + $0x48] sm:$0xff] %v3798_v6  ;;  %v988_v27 = vpop.f32.mrb[10].mxu0  ;;  %v1910_v19 = vpop.f32.mrb[10].mxu1 }
 0x1e7   :  { %v3783_v54 = vadd.f32 %v988_v27, %v4877_v53  ;;  %v3799_v5 = vadd.f32 %v1910_v19, %v4879_v59  ;;  %v990_v4 = vpop.f32.mrb[11].mxu0  ;;  %v1912_v24 = vpop.f32.mrb[11].mxu1 }
 0x1e8   :  { %v3784_v7 = vadd.f32 %v990_v4, %v4881_v33  ;;  %v3800_v22 = vadd.f32 %v1912_v24, %v4883_v41 }
 0x1e9   :  { %1017 = vst [vmem:[#allocation2 + $0x50] sm:$0xff] %v3783_v54  ;;  %1939 = vst [vmem:[#allocation3 + $0x50] sm:$0xff] %v3799_v5 }
 0x1ea   :  { %1018 = vst [vmem:[#allocation2 + $0x58] sm:$0xff] %v3784_v7  ;;  %1940 = vst [vmem:[#allocation3 + $0x58] sm:$0xff] %v3800_v22  ;;  %v995_v44 = vpop.f32.mrb[12].mxu0  ;;  %v1917_v58 = vpop.f32.mrb[12].mxu1 }
 0x1eb   :  { %v3785_v60 = vadd.f32 %v995_v44, %v4877_v53  ;;  %v3801_v61 = vadd.f32 %v1917_v58, %v4879_v59  ;;  %v997_v30 = vpop.f32.mrb[13].mxu0  ;;  %v1919_v31 = vpop.f32.mrb[13].mxu1 }
 0x1ec   :  { %v3786_v21 = vadd.f32 %v997_v30, %v4881_v33  ;;  %v3802_v29 = vadd.f32 %v1919_v31, %v4883_v41 }
 0x1ed   :  { %1019 = vst [vmem:[#allocation2 + $0x60] sm:$0xff] %v3785_v60  ;;  %1941 = vst [vmem:[#allocation3 + $0x60] sm:$0xff] %v3801_v61 }
 0x1ee   :  { %1020 = vst [vmem:[#allocation2 + $0x68] sm:$0xff] %v3786_v21  ;;  %1942 = vst [vmem:[#allocation3 + $0x68] sm:$0xff] %v3802_v29  ;;  %v1002_v32 = vpop.f32.mrb[14].mxu0  ;;  %v1924_v3 = vpop.f32.mrb[14].mxu1 }
 0x1ef   :  { %v3787_v51 = vadd.f32 %v1002_v32, %v4877_v53  ;;  %v3803_v2 = vadd.f32 %v1924_v3, %v4879_v59  ;;  %v1004_v42 = vpop.f32.mrb[15].mxu0  ;;  %v1926_v45 = vpop.f32.mrb[15].mxu1 }
 0x1f0   :  { %v3788_v46 = vadd.f32 %v1004_v42, %v4881_v33  ;;  %v3804_v47 = vadd.f32 %v1926_v45, %v4883_v41 }
 0x1f1   :  { %1021 = vst [vmem:[#allocation2 + $0x70] sm:$0xff] %v3787_v51  ;;  %1943 = vst [vmem:[#allocation3 + $0x70] sm:$0xff] %v3803_v2 }
 0x1f2   :  { %1022 = vst [vmem:[#allocation2 + $0x78] sm:$0xff] %v3788_v46  ;;  %1944 = vst [vmem:[#allocation3 + $0x78] sm:$0xff] %v3804_v47 }
 0x1f3 LB: > { %5768 = vst [vmem:[#allocation50_spill] sm:$0xff] %v4177_v48  ;;  %5769 = vst [vmem:[#allocation51_spill] sm:$0xff] %v4185_v35  ;;  %v5770_v53 = vld [vmem:[#allocation17_spill] sm:$0xff]  ;;  %v5771_v33 = vld [vmem:[#allocation19_spill] sm:$0xff]  ;;  %s4201_s6 = smov 64   ;;  %vm1998_vm1 = vcmask 523264   ;;  %s4193_s3 = sphi %s4925_s3, %s1982_s3   ;;  %v4189_v36 = vphi %v4923_v36, %v2671_v36   ;;  %v4185_v35 = vphi %v4921_v35, %v2669_v35   ;;  %v4181_v49 = vphi %v4919_v49, %v3362_v49   ;;  %v4177_v48 = vphi %v4917_v48, %v3360_v48  }
 0x1f4   : > { %v2001_v59 = vand.u32 4294901760, %v5770_v53  ;;  %v2005_v41 = vand.u32 4294901760, %v5771_v33  ;;  %v5772_v57 = vld [vmem:[#allocation16_spill] sm:$0xff]  ;;  %v5773_v38 = vld [vmem:[#allocation18_spill] sm:$0xff]  ;;  %1996 = vrot.lane.b32.xlu0 %v4189_v36, %s4201_s6  ;;  %v5775_v14 = vld [vmem:[#allocation21_spill] sm:$0xff]  ;;  %s3477_s21 = sshll.u32 %s4193_s3, 3 }
 0x1f5   : > { %v2003_v37 = vand.u32 4294901760, %v5772_v57  ;;  %v2007_v40 = vand.u32 4294901760, %v5773_v38  ;;  %v2009_v39 = vand.u32 4294901760, %v5775_v14  ;;  %v5777_v56 = vld [vmem:[#allocation23_spill] sm:$0xff]  ;;  %v5778_v15 = vld [vmem:[#allocation33_spill] sm:$0xff]  ;;  %v5780_v10 = vld [vmem:[#allocation20_spill] sm:$0xff] }
 0x1f6   : > { %v4943_v28 = vpack.c.bf16 %v2005_v41, %v2001_v59  ;;  %v4946_v34 = vsub.f32 %v5770_v53, %v2001_v59  ;;  %v4950_v0 = vsub.f32 %v5771_v33, %v2005_v41  ;;  %v2013_v63 = vand.u32 4294901760, %v5777_v56  ;;  %v5779_v9 = vld [vmem:[#allocation35_spill] sm:$0xff]  ;;  %v5782_v12 = vld [vmem:[#allocation22_spill] sm:$0xff]  ;;  %v5783_v13 = vld [vmem:[#allocation32_spill] sm:$0xff]  ;;  %s2678_s22 = ssub.s32 7, %s4193_s3  ;;  %s1988_s23 = sshra.s32 %s3477_s21, 3 }
 0x1f7   : > { %v4952_v23 = vpack.c.bf16 %v2007_v40, %v2003_v37  ;;  %v4955_v26 = vsub.f32 %v5772_v57, %v2003_v37  ;;  %v4960_v50 = vsub.f32 %v5773_v38, %v2007_v40  ;;  %v2692_v16 = vand.u32 4294901760, %v5778_v15  ;;  %v5786_v19 = vld [vmem:[#allocation34_spill] sm:$0xff]  ;;  %v5787_v4 = vld [vmem:[#allocation25_spill] sm:$0xff]  ;;  %v5788_v7 = vld [vmem:[#allocation27_spill] sm:$0xff]  ;;  %s5528_s24 = sshll.u32 %s2678_s22, 3  ;;  %s3483_s4 = sshll.u32 %s1988_s23, 4 }
 0x1f8   : > { %5774 = vst [vmem:[#allocation52_spill] sm:$0xff] %v4943_v28  ;;  %3582 = vmatprep.subr.bf16.mxu0 %v4943_v28  ;;  %v2696_v55 = vand.u32 4294901760, %v5779_v9  ;;  %v2011_v25 = vand.u32 4294901760, %v5780_v10  ;;  %v4966_v1 = vpack.c.bf16 %v2013_v63, %v2009_v39  ;;  %v4969_v11 = vsub.f32 %v5775_v14, %v2009_v39  ;;  %2688 = vrot.lane.b32.xlu0 %v4181_v49, %s4201_s6  ;;  %v5789_v44 = vld [vmem:[#allocation37_spill] sm:$0xff]  ;;  %v5791_v30 = vld [vmem:[#allocation39_spill] sm:$0xff]  ;;  %v5792_v21 = vld [vmem:[#allocation24_spill] sm:$0xff] }
 0x1f9   : > { %5776 = vst [vmem:[#allocation53_spill] sm:$0xff] %v4952_v23  ;;  %3584 = vmatpush1.bf16.msra.mxu0 %v4952_v23  ;;  %v2015_v52 = vand.u32 4294901760, %v5782_v12  ;;  %v2694_v20 = vand.u32 4294901760, %v5783_v13  ;;  %v4975_v8 = vsub.f32 %v5777_v56, %v2013_v63  ;;  %v4980_v17 = vsub.f32 %v5778_v15, %v2692_v16  ;;  %v5795_v46 = vld [vmem:[#allocation26_spill] sm:$0xff]  ;;  %v5796_v36 = vld [vmem:[#allocation36_spill] sm:$0xff]  ;;  %v5799_v39 = vld [vmem:[#allocation29_spill] sm:$0xff] }
 0x1fa   : > { %5781 = vst [vmem:[#allocation54_spill] sm:$0xff] %v4966_v1  ;;  %v4977_v62 = vpack.c.bf16 %v2696_v55, %v2692_v16  ;;  %v4983_v43 = vsub.f32 %v5779_v9, %v2696_v55  ;;  %3586 = vmatprep.subr.bf16.mxu0 %v4966_v1  ;;  %v4989_v6 = vsub.f32 %v5780_v10, %v2011_v25  ;;  %v2698_v54 = vand.u32 4294901760, %v5786_v19  ;;  %v5798_v37 = vld [vmem:[#allocation38_spill] sm:$0xff]  ;;  %v5800_v16 = vld [vmem:[#allocation31_spill] sm:$0xff]  ;;  %s2680_s25 = sshra.s32 %s5528_s24, 3  ;;  %s1992_s28 = scalar_lea.vmem [#allocation2], %s3483_s4 }
 0x1fb   : > { %v4986_v18 = vpack.c.bf16 %v2015_v52, %v2011_v25  ;;  %v4992_v27 = vsub.f32 %v5782_v12, %v2015_v52  ;;  %v4997_v5 = vsub.f32 %v5783_v13, %v2694_v20  ;;  %v2017_v24 = vand.u32 4294901760, %v5787_v4  ;;  %v5808_v12 = vld [vmem:[#allocation30_spill] sm:$0xff]  ;;  %v5809_v13 = vld [vmem:[#allocation40_spill] sm:$0xff]  ;;  %s3484_s26 = sshll.u32 %s2680_s25, 4  ;;  %s2676_s29 = scalar_lea.vmem [#allocation4], %s3477_s21 }
 0x1fc   : > { %5784 = vst [vmem:[#allocation55_spill] sm:$0xff] %v4977_v62  ;;  %3678 = vmatprep.subr.bf16.mxu1 %v4977_v62  ;;  %v2021_v22 = vand.u32 4294901760, %v5788_v7  ;;  %v2700_v58 = vand.u32 4294901760, %v5789_v44  ;;  %v5003_v60 = vpack.c.bf16 %v2698_v54, %v2694_v20  ;;  %v5006_v61 = vsub.f32 %v5786_v19, %v2698_v54  ;;  %v5802_v20 = vld [vmem:[#allocation41_spill] sm:$0xff]  ;;  %s2684_s1 = scalar_lea.vmem [#allocation3], %s3484_s26  ;;  %s3367_s30 = scalar_lea.vmem [#allocation5], %s5528_s24 }
 0x1fd   : > { %5785 = vst [vmem:[#allocation56_spill] sm:$0xff] %v4986_v18  ;;  %3588 = vmatpush1.bf16.msra.mxu0 %v4986_v18  ;;  %v2704_v31 = vand.u32 4294901760, %v5791_v30  ;;  %v2019_v29 = vand.u32 4294901760, %v5792_v21  ;;  %v5013_v3 = vsub.f32 %v5787_v4, %v2017_v24  ;;  %v2023_v47 = vand.u32 4294901760, %v5795_v46  ;;  %s1982_s3 = sadd.s32 1, %s4193_s3  }
 0x1fe   : > { %5790 = vst [vmem:[#allocation57_spill] sm:$0xff] %v5003_v60  ;;  %v5010_v32 = vpack.c.bf16 %v2021_v22, %v2017_v24  ;;  %v5016_v51 = vsub.f32 %v5788_v7, %v2021_v22  ;;  %v5019_v2 = vsub.f32 %v5789_v44, %v2700_v58  ;;  %3680 = vmatpush1.bf16.msra.mxu1 %v5003_v60  ;;  %v2702_v41 = vand.u32 4294901760, %v5796_v36  ;;  %v5803_v24 = vld [vmem:[#allocation43_spill] sm:$0xff]  ;;  %p1979_p10 = scmp.ge.s32.totalorder %s1982_s3, 8  }
 0x1ff   : > { %v5022_v42 = vpack.c.bf16 %v2704_v31, %v2700_v58  ;;  %v5025_v45 = vsub.f32 %v5791_v30, %v2704_v31  ;;  %v5029_v49 = vsub.f32 %v5792_v21, %v2019_v29  ;;  %v5797_v59 = vmov %v5796_v36  ;;  %s4203_s8 = smov (%p1979_p10), 64   ;;  %s4204_s9 = smov (%p1979_p10), [#allocation12]  }
 0x200   : > { %5793 = vst [vmem:[#allocation58_spill] sm:$0xff] %v5010_v32  ;;  %3590 = vmatprep.subr.bf16.mxu0 %v5010_v32  ;;  %v2706_v40 = vand.u32 4294901760, %v5798_v37  ;;  %v2025_v63 = vand.u32 4294901760, %v5799_v39  ;;  %v2029_v55 = vand.u32 4294901760, %v5800_v16  ;;  %v5037_v25 = vpack.c.bf16 %v2023_v47, %v2019_v29  ;;  %s3439_s10 = sshll.u32 (%p1979_p10), %s4204_s9, 4  ;;  %s3440_s10 = int_to_ptr.vmem [resolvable:$true] %s3439_s10 }
 0x201   : > { %5794 = vst [vmem:[#allocation59_spill] sm:$0xff] %v5022_v42  ;;  %3682 = vmatprep.subr.bf16.mxu1 %v5022_v42  ;;  %v5040_v52 = vsub.f32 %v5795_v46, %v2023_v47  ;;  %v2708_v54 = vand.u32 4294901760, %v5802_v20  ;;  %v2712_v22 = vand.u32 4294901760, %v5803_v24  ;;  %v5047_v31 = vsub.f32 %v5797_v59, %v2702_v41  ;;  %v5818_v46 = vld [vmem:[#allocation46_spill] sm:$0xff]  ;;  %s4127_s11 = scalar_lea.vmem (%p1979_p10), %s3440_s10, 1024  ;;  %p4132_p12 = scmp.lt.s32.totalorder (%p1979_p10), %s3440_s10, %s3440_s10 }
 0x202   : > { %5801 = vst [vmem:[#allocation60_spill] sm:$0xff] %v5037_v25  ;;  %v5044_v58 = vpack.c.bf16 %v2706_v40, %v2702_v41  ;;  %v5050_v36 = vsub.f32 %v5798_v37, %v2706_v40  ;;  %v5052_v4 = vpack.c.bf16 %v2029_v55, %v2025_v63  ;;  %3592 = vmatpush1.bf16.msra.mxu0 %v5037_v25  ;;  %v5807_v40 = vld [vmem:[#allocation28_spill] sm:$0xff]  ;;  %v2710_v14 = vand.u32 4294901760, %v5809_v13  ;;  %v5816_v37 = vld [vmem:[#allocation47_spill] sm:$0xff]  ;;  %p4128_p11 = scmp.ne.s32.totalorder (%p1979_p10), %s3440_s10, %s4127_s11  ;;  %p4133_p13 = scmp.lt.s32.totalorder (%p1979_p10), %s4127_s11, %s4127_s11 }
 0x203   : > { %v5056_v29 = vsub.f32 %v5799_v39, %v2025_v63  ;;  %v5059_v47 = vsub.f32 %v5800_v16, %v2029_v55  ;;  %v5061_v7 = vpack.c.bf16 %v2712_v22, %v2708_v54  ;;  %v5064_v9 = vsub.f32 %v5802_v20, %v2708_v54  ;;  %v5810_v55 = vld [vmem:[#allocation42_spill] sm:$0xff] }
 0x204   : > { %5804 = vst [vmem:[#allocation61_spill] sm:$0xff] %v5044_v58  ;;  %5805 = vst [vmem:[#allocation62_spill] sm:$0xff] %v5052_v4  ;;  %3684 = vmatpush1.bf16.msra.mxu1 %v5044_v58  ;;  %3594 = vmatprep.subr.bf16.mxu0 %v5052_v4  ;;  %v5069_v41 = vsub.f32 %v5803_v24, %v2712_v22  ;;  %v2027_v10 = vand.u32 4294901760, %v5807_v40  ;;  %v2031_v63 = vand.u32 4294901760, %v5808_v12  ;;  %v2714_v15 = vand.u32 4294901760, %v5810_v55  ;;  %p4134_p0 = por (%p1979_p10), %p4133_p13, %p4132_p12 }
 0x205   : > { %5806 = vst [vmem:[#allocation63_spill] sm:$0xff] %v5061_v7  ;;  %3686 = vmatprep.subr.bf16.mxu1 %v5061_v7  ;;  %v5087_v21 = vsub.f32 %v5809_v13, %v2710_v14  ;;  %v5655_v24 = vmov 0.0   ;;  %v5813_v16 = vand.u32 4294901760, %v4946_v34  ;;  %v5662_v38 = vand.u32 4294901760, %v4955_v26 }
 0x206   : > { %v5078_v19 = vpack.c.bf16 %v2031_v63, %v2027_v10  ;;  %v5081_v20 = vsub.f32 %v5807_v40, %v2027_v10  ;;  %v5084_v22 = vsub.f32 %v5808_v12, %v2031_v63  ;;  %2081 = vmatprep.mubr.f32.mxu0 %v5655_v24  ;;  %v5090_v30 = vpack.c.bf16 %v2714_v15, %v2710_v14  ;;  %v5815_v12 = vld [vmem:[#allocation45_spill] sm:$0xff]  ;;  %v5817_v40 = vld [vmem:[#allocation44_spill] sm:$0xff]  ;;  %p4135_p1 = pnand (%p1979_p10), %p4134_p0, %p4128_p11 }
 0x207   : > { %v5093_v54 = vsub.f32 %v5810_v55, %v2714_v15  ;;  %v2096_v33 = vsub.f32 %v4946_v34, %v5813_v16  ;;  %v5814_v10 = vand.u32 4294901760, %v4950_v0  ;;  %2772 = vmatprep.mubr.f32.mxu1 %v5655_v24  ;;  %v2716_v13 = vand.u32 4294901760, %v5815_v12 }
 0x208   : > { %5811 = vst [vmem:[#allocation64_spill] sm:$0xff] %v5078_v19  ;;  %5812 = vst [vmem:[#allocation65_spill] sm:$0xff] %v5090_v30  ;;  %3596 = vmatpush1.bf16.msra.mxu0 %v5078_v19  ;;  %v2720_v14 = vand.u32 4294901760, %v5816_v37  ;;  %3688 = vmatpush1.bf16.msra.mxu1 %v5090_v30  ;;  %v2718_v44 = vand.u32 4294901760, %v5817_v40  ;;  %v2102_v15 = vsub.f32 %v4955_v26, %v5662_v38  ;;  %v5667_v38 = vand.u32 4294901760, %v4975_v8 }
 0x209   : > { %v2108_v63 = vsub.f32 %v4950_v0, %v5814_v10  ;;  %v2097_v39 = vand.u32 4294901760, %v2096_v33  ;;  %v2722_v10 = vand.u32 4294901760, %v5818_v46  ;;  %v5113_v24 = vsub.f32 %v5815_v12, %v2716_v13 }
 0x20a   : > { %v5110_v53 = vpack.c.bf16 %v2720_v14, %v2716_v13  ;;  %v5116_v55 = vsub.f32 %v5816_v37, %v2720_v14  ;;  %v5820_v33 = vand.u32 4294901760, %v4960_v50  ;;  %v5127_v59 = vsub.f32 %v5817_v40, %v2718_v44 }
 0x20b   : > { %v2109_v16 = vand.u32 4294901760, %v2108_v63  ;;  %v5124_v57 = vpack.c.bf16 %v2722_v10, %v2718_v44  ;;  %v2103_v13 = vand.u32 4294901760, %v2102_v15  ;;  %v5131_v14 = vsub.f32 %v5818_v46, %v2722_v10 }
 0x20c   : > { %5819 = vst [vmem:[#allocation66_spill] sm:$0xff] %v5110_v53  ;;  %v2114_v63 = vsub.f32 %v4960_v50, %v5820_v33  ;;  %3690 = vmatprep.subr.bf16.mxu1 %v5110_v53  ;;  %v5665_v12 = vand.u32 4294901760, %v4969_v11  ;;  %v2132_v10 = vsub.f32 %v4975_v8, %v5667_v38  ;;  %v5677_v37 = vand.u32 4294901760, %v4992_v27 }
 0x20d   : > { %v3597_v56 = vpack.c.bf16 %v2109_v16, %v2097_v39  ;;  %5821 = vst [vmem:[#allocation67_spill] sm:$0xff] %v5124_v57  ;;  %3692 = vmatpush1.bf16.msra.mxu1 %v5124_v57  ;;  %v5668_v16 = vand.u32 4294901760, %v4980_v17  ;;  %v5822_v44 = vand.u32 4294901760, %v4983_v43  ;;  %v5681_v53 = vand.u32 4294901760, %v5006_v61 }
 0x20e   : > { %v2115_v39 = vand.u32 4294901760, %v2114_v63  ;;  %v2120_v15 = vsub.f32 %v4969_v11, %v5665_v12  ;;  %v5823_v12 = vand.u32 4294901760, %v4989_v6  ;;  %v2133_v38 = vand.u32 4294901760, %v2132_v10 }
 0x20f   : > { %3598 = vmatprep.subr.bf16.mxu0 %v3597_v56  ;;  %v2787_v33 = vsub.f32 %v4980_v17, %v5668_v16  ;;  %v2799_v40 = vsub.f32 %v4983_v43, %v5822_v44  ;;  %v2138_v56 = vsub.f32 %v4992_v27, %v5677_v37  ;;  %v2805_v10 = vsub.f32 %v5006_v61, %v5681_v53 }
 0x210   : > { %v5147_v63 = vpack.c.bf16 %v2115_v39, %v2103_v13  ;;  %v2126_v46 = vsub.f32 %v4989_v6, %v5823_v12  ;;  %v2121_v48 = vand.u32 4294901760, %v2120_v15  ;;  %v5824_v13 = vand.u32 4294901760, %v4997_v5 }
 0x211   : > { %v2788_v35 = vand.u32 4294901760, %v2787_v33  ;;  %v2800_v16 = vand.u32 4294901760, %v2799_v40  ;;  %v2139_v30 = vand.u32 4294901760, %v2138_v56  ;;  %v5679_v12 = vand.u32 4294901760, %v5013_v3 }
 0x212   : > { %v2793_v39 = vsub.f32 %v4997_v5, %v5824_v13  ;;  %v2127_v57 = vand.u32 4294901760, %v2126_v46  ;;  %v5165_v44 = vpack.c.bf16 %v2133_v38, %v2121_v48  ;;  %v5678_v37 = vand.u32 4294901760, %v5016_v51 }
 0x213   : > { %v3693_v15 = vpack.c.bf16 %v2800_v16, %v2788_v35  ;;  %v5680_v13 = vand.u32 4294901760, %v5019_v2  ;;  %v2144_v48 = vsub.f32 %v5013_v3, %v5679_v12  ;;  %v5682_v38 = vand.u32 4294901760, %v5025_v45 }
 0x214   : > { %v2794_v19 = vand.u32 4294901760, %v2793_v39  ;;  %v5173_v33 = vpack.c.bf16 %v2139_v30, %v2127_v57  ;;  %v5687_v46 = vand.u32 4294901760, %v5029_v49  ;;  %v2806_v35 = vand.u32 4294901760, %v2805_v10 }
 0x215   : > { %3694 = vmatprep.subr.bf16.mxu1 %v3693_v15  ;;  %v2156_v40 = vsub.f32 %v5016_v51, %v5678_v37  ;;  %v2811_v16 = vsub.f32 %v5019_v2, %v5680_v13  ;;  %v5688_v57 = vand.u32 4294901760, %v5040_v52  ;;  %v2145_v30 = vand.u32 4294901760, %v2144_v48 }
 0x216   : > { %v2823_v56 = vsub.f32 %v5025_v45, %v5682_v38  ;;  %v2150_v39 = vsub.f32 %v5029_v49, %v5687_v46  ;;  %v5691_v15 = vand.u32 4294901760, %v5047_v31  ;;  %v5194_v10 = vpack.c.bf16 %v2806_v35, %v2794_v19 }
 0x217   : > { %v2157_v37 = vand.u32 4294901760, %v2156_v40  ;;  %v2812_v12 = vand.u32 4294901760, %v2811_v16  ;;  %v2162_v13 = vsub.f32 %v5040_v52, %v5688_v57  ;;  %v5689_v7 = vand.u32 4294901760, %v5050_v36 }
 0x218   : > { %v2824_v53 = vand.u32 4294901760, %v2823_v56  ;;  %v2151_v48 = vand.u32 4294901760, %v2150_v39  ;;  %v2817_v38 = vsub.f32 %v5047_v31, %v5691_v15  ;;  %v5690_v19 = vand.u32 4294901760, %v5056_v29 }
 0x219   : > { %v5203_v4 = vpack.c.bf16 %v2157_v37, %v2145_v30  ;;  %v2163_v46 = vand.u32 4294901760, %v2162_v13  ;;  %v5692_v35 = vand.u32 4294901760, %v5059_v47  ;;  %v2829_v56 = vsub.f32 %v5050_v36, %v5689_v7 }
 0x21a   : > { %v5207_v40 = vpack.c.bf16 %v2824_v53, %v2812_v12  ;;  %v2818_v16 = vand.u32 4294901760, %v2817_v38  ;;  %v5695_v39 = vand.u32 4294901760, %v5064_v9  ;;  %v2168_v37 = vsub.f32 %v5056_v29, %v5690_v19 }
 0x21b   : > { %v5213_v57 = vpack.c.bf16 %v2163_v46, %v2151_v48  ;;  %v2180_v13 = vsub.f32 %v5059_v47, %v5692_v35  ;;  %v5698_v53 = vand.u32 4294901760, %v5069_v41  ;;  %v2830_v12 = vand.u32 4294901760, %v2829_v56 }
 0x21c   : > { %v2835_v38 = vsub.f32 %v5064_v9, %v5695_v39  ;;  %v5703_v30 = vand.u32 4294901760, %v5081_v20  ;;  %v5706_v46 = vand.u32 4294901760, %v5084_v22  ;;  %v2169_v48 = vand.u32 4294901760, %v2168_v37 }
 0x21d   : > { %v2181_v7 = vand.u32 4294901760, %v2180_v13  ;;  %v2847_v19 = vsub.f32 %v5069_v41, %v5698_v53  ;;  %v2840_v15 = vand.u32 4294901760, %v5087_v21  ;;  %v5231_v35 = vpack.c.bf16 %v2830_v12, %v2818_v16 }
 0x21e   : > { %v2836_v58 = vand.u32 4294901760, %v2835_v38  ;;  %v2174_v56 = vsub.f32 %v5081_v20, %v5703_v30  ;;  %v2186_v39 = vsub.f32 %v5084_v22, %v5706_v46  ;;  %v2852_v53 = vand.u32 4294901760, %v5093_v54 }
 0x21f   : > { %v5239_v25 = vpack.c.bf16 %v2181_v7, %v2169_v48  ;;  %v2848_v37 = vand.u32 4294901760, %v2847_v19  ;;  %v2841_v13 = vsub.f32 %v5087_v21, %v2840_v15  ;;  %v2858_v12 = vand.u32 4294901760, %v5113_v24 }
 0x220   : > { %v2175_v42 = vand.u32 4294901760, %v2174_v56  ;;  %v2187_v32 = vand.u32 4294901760, %v2186_v39  ;;  %v2853_v60 = vsub.f32 %v5093_v54, %v2852_v53  ;;  %v2870_v7 = vand.u32 4294901760, %v5116_v55 }
 0x221   : > { %v5246_v38 = vpack.c.bf16 %v2848_v37, %v2836_v58  ;;  %v2842_v30 = vand.u32 4294901760, %v2841_v13  ;;  %v2859_v19 = vsub.f32 %v5113_v24, %v2858_v12  ;;  %v2864_v39 = vand.u32 4294901760, %v5127_v59 }
 0x222   : > { %v5250_v48 = vpack.c.bf16 %v2187_v32, %v2175_v42  ;;  %v2854_v46 = vand.u32 4294901760, %v2853_v60  ;;  %v2871_v16 = vsub.f32 %v5116_v55, %v2870_v7  ;;  %v2876_v58 = vand.u32 4294901760, %v5131_v14 }
 0x223   : > { %v2860_v13 = vand.u32 4294901760, %v2859_v19  ;;  %v2865_v18 = vsub.f32 %v5127_v59, %v2864_v39  ;;  %v5831_v37 = vand.u32 4294901760, %v4969_v11  ;;  %v5832_v32 = vand.u32 4294901760, %v4975_v8 }
 0x224   : > { %v5265_v56 = vpack.c.bf16 %v2854_v46, %v2842_v30  ;;  %v2872_v62 = vand.u32 4294901760, %v2871_v16  ;;  %v2877_v60 = vsub.f32 %v5131_v14, %v2876_v58  ;;  %v5826_v46 = vand.u32 4294901760, %v4950_v0 }
 0x225   : > { %v2866_v23 = vand.u32 4294901760, %v2865_v18  ;;  %v5828_v18 = vand.u32 4294901760, %v4955_v26  ;;  %v5829_v16 = vand.u32 4294901760, %v4960_v50 }
 0x226   : > { %v3705_v28 = vpack.c.bf16 %v2872_v62, %v2860_v13  ;;  %v2878_v42 = vand.u32 4294901760, %v2877_v60  ;;  %v5825_v60 = vand.u32 4294901760, %v4946_v34  ;;  %v5835_v13 = vand.u32 4294901760, %v4983_v43 }
 0x227   : > { %v5300_v19 = vpack.c.bf16 %v5829_v16, %v5828_v18  ;;  %v5840_v18 = vand.u32 4294901760, %v4997_v5  ;;  %v5841_v16 = vand.u32 4294901760, %v5006_v61 }
 0x228   : > { %v3707_v62 = vpack.c.bf16 %v2878_v42, %v2866_v23  ;;  %v5294_v30 = vpack.c.bf16 %v5826_v46, %v5825_v60  ;;  %v5306_v23 = vpack.c.bf16 %v5832_v32, %v5831_v37  ;;  %v5834_v42 = vand.u32 4294901760, %v4980_v17 }
 0x229   : > { %5830 = vst [vmem:[#allocation69_spill] sm:$0xff] %v5300_v19  ;;  %v5837_v46 = vand.u32 4294901760, %v4989_v6  ;;  %v5838_v60 = vand.u32 4294901760, %v4992_v27  ;;  %v5324_v19 = vpack.c.bf16 %v5841_v16, %v5840_v18  ;;  %v5843_v37 = vand.u32 4294901760, %v5013_v3 }
 0x22a   : > { %5827 = vst [vmem:[#allocation68_spill] sm:$0xff] %v5294_v30  ;;  %5833 = vst [vmem:[#allocation70_spill] sm:$0xff] %v5306_v23  ;;  %v5312_v1 = vpack.c.bf16 %v5835_v13, %v5834_v42  ;;  %v5844_v32 = vand.u32 4294901760, %v5016_v51  ;;  %v5846_v13 = vand.u32 4294901760, %v5019_v2  ;;  %v5847_v42 = vand.u32 4294901760, %v5025_v45 }
 0x22b   : > { %v5318_v30 = vpack.c.bf16 %v5838_v60, %v5837_v46  ;;  %5842 = vst [vmem:[#allocation73_spill] sm:$0xff] %v5324_v19  ;;  %v5849_v46 = vand.u32 4294901760, %v5029_v49  ;;  %v5850_v60 = vand.u32 4294901760, %v5040_v52  ;;  %v5852_v18 = vand.u32 4294901760, %v5047_v31 }
 0x22c   : > { %5836 = vst [vmem:[#allocation71_spill] sm:$0xff] %v5312_v1  ;;  %v5330_v23 = vpack.c.bf16 %v5844_v32, %v5843_v37  ;;  %v5336_v1 = vpack.c.bf16 %v5847_v42, %v5846_v13  ;;  %v5853_v16 = vand.u32 4294901760, %v5050_v36  ;;  %v5855_v37 = vand.u32 4294901760, %v5056_v29 }
 0x22d   : > { %5839 = vst [vmem:[#allocation72_spill] sm:$0xff] %v5318_v30  ;;  %v5342_v30 = vpack.c.bf16 %v5850_v60, %v5849_v46  ;;  %v5856_v32 = vand.u32 4294901760, %v5059_v47  ;;  %v5858_v13 = vand.u32 4294901760, %v5064_v9  ;;  %v5859_v42 = vand.u32 4294901760, %v5069_v41 }
 0x22e   : > { %5845 = vst [vmem:[#allocation74_spill] sm:$0xff] %v5330_v23  ;;  %5848 = vst [vmem:[#allocation75_spill] sm:$0xff] %v5336_v1  ;;  %v5348_v19 = vpack.c.bf16 %v5853_v16, %v5852_v18  ;;  %v5861_v46 = vand.u32 4294901760, %v5081_v20  ;;  %v5862_v60 = vand.u32 4294901760, %v5084_v22  ;;  %v5368_v18 = vpack.c.bf16 %v2852_v53, %v2840_v15 }
 0x22f   : > { %5851 = vst [vmem:[#allocation76_spill] sm:$0xff] %v5342_v30  ;;  %v5354_v23 = vpack.c.bf16 %v5856_v32, %v5855_v37  ;;  %v5360_v1 = vpack.c.bf16 %v5859_v42, %v5858_v13  ;;  %v5370_v16 = vpack.c.bf16 %v2870_v7, %v2858_v12 }
 0x230   : > { %5854 = vst [vmem:[#allocation77_spill] sm:$0xff] %v5348_v19  ;;  %v5366_v30 = vpack.c.bf16 %v5862_v60, %v5861_v46  ;;  %v5372_v19 = vpack.c.bf16 %v2876_v58, %v2864_v39  ;;  %v5863_v60 = vmov 0.0  }
 0x231   : > { %5857 = vst [vmem:[#allocation78_spill] sm:$0xff] %v5354_v23  ;;  %5860 = vst [vmem:[#allocation79_spill] sm:$0xff] %v5360_v1 }
 0x266   : > { %v1997_v37 = vpop.permute.xlu0 %1996 }
 0x267   : > { %v1999_v32 = vsel %vm1998_vm1, %v1997_v37, 0 }
 0x268   : > { %v5375_v23 = vand.u32 4294901760, %v1999_v32 }
 0x26a   : > { %v5378_v13 = vsub.f32 %v1999_v32, %v5375_v23  ;;  %v2689_v42 = vpop.permute.xlu0 %2688 }
 0x26b   : > { %v2690_v1 = vsel %vm1998_vm1, %v2689_v42, 0 }
 0x26c   : > { %v2084_v46 = vand.u32 4294901760, %v5378_v13  ;;  %v5382_v15 = vand.u32 4294901760, %v2690_v1 }
 0x26e   : > { %v5385_v53 = vsub.f32 %v2690_v1, %v5382_v15  ;;  %v2085_v12 = vsub.f32 %v5378_v13, %v2084_v46 }
 0x270   : > { %v2775_v7 = vand.u32 4294901760, %v5385_v53  ;;  %v2086_v39 = vand.u32 4294901760, %v2085_v12  ;;  %v2686_v12 = vld [vmem:[%s2684_s1 + $0x8] sm:$0xff] }
 0x272   : > { %2087 = vmatmul.mubr.f32.vlgmr.msra.gmra.mrb[0].mxu0 %v2086_v39  ;;  %v2776_v58 = vsub.f32 %v5385_v53, %v2775_v7 }
 0x273   : > { %3600 = vmatpush1.bf16.msra.mxu0 %v5147_v63  ;;  %2237 = vmatprep.mubr.f32.mxu0 %v5863_v60  ;;  %v5864_v63 = vpack.c.bf16 %v4950_v0, %v4946_v34  ;;  %v5869_v34 = vpack.c.bf16 %v5006_v61, %v4997_v5  ;;  %v5870_v0 = vpack.c.bf16 %v5016_v51, %v5013_v3  ;;  %v5880_v61 = vld [vmem:[#allocation53_spill] sm:$0xff]  ;;  %v5882_v3 = vld [vmem:[#allocation54_spill] sm:$0xff]  ;;  %v5883_v51 = vld [vmem:[#allocation55_spill] sm:$0xff] }
 0x274   : > { %3602 = vmatprep.subr.bf16.mxu0 %v5165_v44  ;;  %v2777_v1 = vand.u32 4294901760, %v2776_v58  ;;  %v5867_v44 = vpack.c.bf16 %v4983_v43, %v4980_v17  ;;  %v5875_v17 = vpack.c.bf16 %v5069_v41, %v5064_v9  ;;  %v5876_v43 = vpack.c.bf16 %v5084_v22, %v5081_v20  ;;  %v5890_v20 = vld [vmem:[#allocation62_spill] sm:$0xff]  ;;  %v5896_v41 = vld [vmem:[#allocation69_spill] sm:$0xff]  ;;  %v5899_v22 = vld [vmem:[#allocation71_spill] sm:$0xff] }
 0x275   : > { %v5879_v5 = vpack.c.bf16 %v5116_v55, %v5113_v24  ;;  %v5881_v9 = vpack.c.bf16 %v5131_v14, %v5127_v59  ;;  %v5888_v59 = vld [vmem:[#allocation60_spill] sm:$0xff]  ;;  %v5891_v24 = vld [vmem:[#allocation63_spill] sm:$0xff] }
 0x276   : > { %2778 = vmatmul.mubr.f32.vlgmr.msra.gmra.mrb[0].mxu1 %v2777_v1  ;;  %v5897_v55 = vld [vmem:[#allocation67_spill] sm:$0xff]  ;;  %v5900_v14 = vld [vmem:[#allocation72_spill] sm:$0xff] }
 0x277   : > { %3604 = vmatpush1.bf16.msra.mxu0 %v5173_v33  ;;  %3696 = vmatpush1.bf16.msra.mxu1 %v5194_v10  ;;  %v5901_v33 = vld [vmem:[#allocation73_spill] sm:$0xff]  ;;  %v5903_v10 = vld [vmem:[#allocation75_spill] sm:$0xff] }
 0x278   : > { %3606 = vmatprep.subr.bf16.mxu0 %v5203_v4  ;;  %3698 = vmatprep.subr.bf16.mxu1 %v5207_v40  ;;  %v5865_v4 = vpack.c.bf16 %v4960_v50, %v4955_v26  ;;  %v5871_v26 = vpack.c.bf16 %v5025_v45, %v5019_v2  ;;  %v5872_v50 = vpack.c.bf16 %v5040_v52, %v5029_v49  ;;  %v5885_v2 = vld [vmem:[#allocation57_spill] sm:$0xff]  ;;  %v5886_v45 = vld [vmem:[#allocation58_spill] sm:$0xff]  ;;  %v5887_v49 = vld [vmem:[#allocation59_spill] sm:$0xff] }
 0x279   : > { %2928 = vmatprep.mubr.f32.mxu1 %v5863_v60  ;;  %v5889_v52 = vld [vmem:[#allocation61_spill] sm:$0xff] }
 0x27a   : > { %v5905_v40 = vld [vmem:[#allocation77_spill] sm:$0xff] }
 0x27b   : > { %3608 = vmatpush1.bf16.msra.mxu0 %v5213_v57  ;;  %3700 = vmatpush1.bf16.msra.mxu1 %v5231_v35  ;;  %v5902_v57 = vld [vmem:[#allocation74_spill] sm:$0xff]  ;;  %v5904_v35 = vld [vmem:[#allocation76_spill] sm:$0xff] }
 0x27c   : > { %3610 = vmatprep.subr.bf16.mxu0 %v5239_v25  ;;  %3702 = vmatprep.subr.bf16.mxu1 %v5246_v38  ;;  %v5866_v25 = vpack.c.bf16 %v4975_v8, %v4969_v11  ;;  %v5873_v11 = vpack.c.bf16 %v5050_v36, %v5047_v31  ;;  %v5874_v8 = vpack.c.bf16 %v5059_v47, %v5056_v29  ;;  %v5892_v31 = vld [vmem:[#allocation64_spill] sm:$0xff]  ;;  %v5893_v36 = vld [vmem:[#allocation65_spill] sm:$0xff]  ;;  %v5895_v47 = vld [vmem:[#allocation66_spill] sm:$0xff] }
 0x27d   : > { %v5894_v29 = vld [vmem:[#allocation68_spill] sm:$0xff]  ;;  %v5906_v38 = vld [vmem:[#allocation78_spill] sm:$0xff] }
 0x27f   : > { %3612 = vmatpush1.bf16.msra.mxu0 %v5250_v48  ;;  %3704 = vmatpush1.bf16.msra.mxu1 %v5265_v56  ;;  %v5907_v48 = vld [vmem:[#allocation79_spill] sm:$0xff]  ;;  %v1993_v56 = vld [vmem:[%s1992_s28] sm:$0xff] }
 0x280   : > { %3614 = vmatprep.subr.bf16.mxu0 %v5864_v63  ;;  %3706 = vmatprep.subr.bf16.mxu1 %v3705_v28  ;;  %v5868_v28 = vpack.c.bf16 %v4992_v27, %v4989_v6  ;;  %v5877_v6 = vpack.c.bf16 %v5093_v54, %v5087_v21  ;;  %v5878_v27 = vld [vmem:[#allocation52_spill] sm:$0xff]  ;;  %v5898_v54 = vld [vmem:[#allocation70_spill] sm:$0xff] }
 0x281   : > { %v5884_v21 = vld [vmem:[#allocation56_spill] sm:$0xff] }
 0x282   : > { %2239 = vmatmul.mubr.f32.vlgmr.msra.gmra.mrb[0].mxu0 %v5375_v23 }
 0x283   : > { %3616 = vmatpush1.bf16.msra.mxu0 %v5865_v4  ;;  %3708 = vmatpush1.bf16.msra.mxu1 %v3707_v62 }
 0x284   : > { %3618 = vmatprep.subr.bf16.mxu0 %v5866_v25  ;;  %3710 = vmatprep.subr.bf16.mxu1 %v5867_v44 }
 0x285   : > { %2341 = vmatprep.mubr.f32.mxu0 %v5863_v60 }
 0x286   : > { %2930 = vmatmul.mubr.f32.vlgmr.msra.gmra.mrb[0].mxu1 %v5382_v15 }
 0x287   : > { %3620 = vmatpush1.bf16.msra.mxu0 %v5868_v28  ;;  %3712 = vmatpush1.bf16.msra.mxu1 %v5869_v34 }
 0x288   : > { %3622 = vmatprep.subr.bf16.mxu0 %v5870_v0  ;;  %3714 = vmatprep.subr.bf16.mxu1 %v5871_v26 }
 0x289   : > { %3032 = vmatprep.mubr.f32.mxu1 %v5863_v60 }
 0x28b   : > { %3624 = vmatpush1.bf16.msra.mxu0 %v5872_v50  ;;  %3716 = vmatpush1.bf16.msra.mxu1 %v5873_v11 }
 0x28c   : > { %3626 = vmatprep.subr.bf16.mxu0 %v5874_v8  ;;  %3718 = vmatprep.subr.bf16.mxu1 %v5875_v17 }
 0x28f   : > { %3628 = vmatpush1.bf16.msra.mxu0 %v5876_v43  ;;  %3720 = vmatpush1.bf16.msra.mxu1 %v5877_v6  ;;  %v5908_v6 = vld [vmem:[#allocation51_spill] sm:$0xff] }
 0x290   : > { %3630 = vmatprep.subr.bf16.mxu0 %v5878_v27  ;;  %3722 = vmatprep.subr.bf16.mxu1 %v5879_v5 }
 0x292   : > { %2344 = vmatmul.mubr.f32.vlgmr.msra.gmra.mrb[0].mxu0 %v5378_v13 }
 0x293   : > { %3632 = vmatpush1.bf16.msra.mxu0 %v5880_v61  ;;  %3724 = vmatpush1.bf16.msra.mxu1 %v5881_v9  ;;  %v5909_v9 = vld [vmem:[#allocation50_spill] sm:$0xff] }
 0x294   : > { %3634 = vmatprep.subr.bf16.mxu0 %v5882_v3  ;;  %3726 = vmatprep.subr.bf16.mxu1 %v5883_v51 }
 0x295   : > { %2430 = vmatprep.mubr.f32.mxu0 %v5863_v60 }
 0x296   : > { %3035 = vmatmul.mubr.f32.vlgmr.msra.gmra.mrb[0].mxu1 %v5385_v53 }
 0x297   : > { %3636 = vmatpush1.bf16.msra.mxu0 %v5884_v21  ;;  %3728 = vmatpush1.bf16.msra.mxu1 %v5885_v2 }
 0x298   : > { %3638 = vmatprep.subr.bf16.mxu0 %v5886_v45  ;;  %3730 = vmatprep.subr.bf16.mxu1 %v5887_v49 }
 0x299   : > { %3121 = vmatprep.mubr.f32.mxu1 %v5863_v60 }
 0x29b   : > { %3640 = vmatpush1.bf16.msra.mxu0 %v5888_v59  ;;  %3732 = vmatpush1.bf16.msra.mxu1 %v5889_v52 }
 0x29c   : > { %3642 = vmatprep.subr.bf16.mxu0 %v5890_v20  ;;  %3734 = vmatprep.subr.bf16.mxu1 %v5891_v24 }
 0x29f   : > { %3644 = vmatpush1.bf16.msra.mxu0 %v5892_v31  ;;  %3736 = vmatpush1.bf16.msra.mxu1 %v5893_v36 }
 0x2a0   : > { %3646 = vmatprep.subr.bf16.mxu0 %v5894_v29  ;;  %3738 = vmatprep.subr.bf16.mxu1 %v5895_v47 }
 0x2a2   : > { %2434 = vmatmul.mubr.f32.vlgmr.msra.gmra.mrb[0].mxu0 %v2084_v46 }
 0x2a3   : > { %3648 = vmatpush1.bf16.msra.mxu0 %v5896_v41  ;;  %3740 = vmatpush1.bf16.msra.mxu1 %v5897_v55 }
 0x2a4   : > { %3650 = vmatprep.subr.bf16.mxu0 %v5898_v54  ;;  %3742 = vmatprep.subr.bf16.mxu1 %v5899_v22 }
 0x2a5   : > { %2552 = vmatprep.mubr.f32.mxu0 %v5863_v60 }
 0x2a6   : > { %3125 = vmatmul.mubr.f32.vlgmr.msra.gmra.mrb[0].mxu1 %v2775_v7 }
 0x2a7   : > { %3652 = vmatpush1.bf16.msra.mxu0 %v5900_v14  ;;  %3744 = vmatpush1.bf16.msra.mxu1 %v5901_v33 }
 0x2a8   : > { %3654 = vmatprep.subr.bf16.mxu0 %v5902_v57  ;;  %3746 = vmatprep.subr.bf16.mxu1 %v5903_v10 }
 0x2a9   : > { %3243 = vmatprep.mubr.f32.mxu1 %v5863_v60 }
 0x2ab   : > { %3656 = vmatpush1.bf16.msra.mxu0 %v5904_v35  ;;  %3748 = vmatpush1.bf16.msra.mxu1 %v5905_v40 }
 0x2ac   : > { %3658 = vmatprep.subr.bf16.mxu0 %v5906_v38  ;;  %3750 = vmatprep.subr.bf16.mxu1 %v5907_v48 }
 0x2af   : > { %3660 = vmatpush1.bf16.msra.mxu0 %v5366_v30  ;;  %3752 = vmatpush1.bf16.msra.mxu1 %v5368_v18 }
 0x2b0   : > { %3662 = vmatprep.subr.bf16.mxu0 %v5878_v27  ;;  %3754 = vmatprep.subr.bf16.mxu1 %v5370_v16 }
 0x2b2   : > { %2554 = vmatmul.mubr.f32.vlgmr.msra.gmra.mrb[0].mxu0 %v5375_v23 }
 0x2b3   : > { %3664 = vmatpush1.bf16.msra.mxu0 %v5880_v61  ;;  %3756 = vmatpush1.bf16.msra.mxu1 %v5372_v19 }
 0x2b4   : > { %3666 = vmatprep.subr.bf16.mxu0 %v5882_v3  ;;  %3758 = vmatprep.subr.bf16.mxu1 %v5883_v51 }
 0x2b5   : > { %2640 = vmatprep.mubr.f32.mxu0 %v5863_v60 }
 0x2b6   : > { %3245 = vmatmul.mubr.f32.vlgmr.msra.gmra.mrb[0].mxu1 %v5382_v15 }
 0x2b7   : > { %3668 = vmatpush1.bf16.msra.mxu0 %v5884_v21  ;;  %3760 = vmatpush1.bf16.msra.mxu1 %v5885_v2 }
 0x2b8   : > { %3670 = vmatprep.subr.bf16.mxu0 %v5886_v45  ;;  %3762 = vmatprep.subr.bf16.mxu1 %v5887_v49 }
 0x2b9   : > { %3331 = vmatprep.mubr.f32.mxu1 %v5863_v60 }
 0x2bb   : > { %3672 = vmatpush1.bf16.msra.mxu0 %v5888_v59  ;;  %3764 = vmatpush1.bf16.msra.mxu1 %v5889_v52 }
 0x2bc   : > { %3674 = vmatprep.subr.bf16.mxu0 %v5890_v20  ;;  %3766 = vmatprep.subr.bf16.mxu1 %v5891_v24 }
 0x2bf   : > { %3676 = vmatpush1.bf16.msra.mxu0 %v5892_v31  ;;  %3768 = vmatpush1.bf16.msra.mxu1 %v5893_v36 }
 0x2c0   : > { %3770 = vmatprep.subr.bf16.mxu1 %v5895_v47 }
 0x2c2   : > { %2642 = vmatmul.mubr.f32.vlgmr.msra.gmra.mrb[0].mxu0 %v5375_v23  ;;  %v2685_v23 = vld [vmem:[%s2684_s1] sm:$0xff] }
 0x2c3   : > { %3772 = vmatpush1.bf16.msra.mxu1 %v5897_v55 }
 0x2c6   : > { %3333 = vmatmul.mubr.f32.vlgmr.msra.gmra.mrb[0].mxu1 %v5382_v15  ;;  %v1994_v15 = vld [vmem:[%s1992_s28 + $0x8] sm:$0xff] }
 0x395   : > { %v2643_v19 = vpop.f32.mrb[0].mxu0 }
 0x396   : > { %v2648_v30 = vadd.f32 %v2643_v19, %v1993_v56  ;;  %v2645_v62 = vpop.f32.mrb[1].mxu0 }
 0x397   : > { %v2649_v53 = vadd.f32 %v2645_v62, %v1994_v15 }
 0x398   : > { %v2650_v18 = vsub.f32 0.0, %v2648_v30 }
 0x399   : > { %v3334_v16 = vpop.f32.mrb[0].mxu1  ;;  %v2657_v0 = vsub.f32 0.0, %v2649_v53 }
 0x39a   : > { %v2651_v37 = vmul.f32 1.442695, %v2650_v18  ;;  %v3339_v32 = vadd.f32 %v3334_v16, %v2685_v23  ;;  %v3336_v13 = vpop.f32.mrb[1].mxu1 }
 0x39b   : > { %v3340_v58 = vadd.f32 %v3336_v13, %v2686_v12  ;;  %v2658_v26 = vmul.f32 1.442695, %v2657_v0 }
 0x39c   : > { %4037 = vpow2.f32 %v2651_v37  ;;  %v3341_v42 = vsub.f32 0.0, %v3339_v32 }
 0x39d   : > { %v3348_v50 = vsub.f32 0.0, %v3340_v58 }
 0x39e   : > { %v3342_v46 = vmul.f32 1.442695, %v3341_v42 }
 0x39f   : > { %v3349_v11 = vmul.f32 1.442695, %v3348_v50 }
 0x3a0   : > { %4039 = vpow2.f32 %v3342_v46 }
 0x3a1   : > { %4041 = vtanh.f32 %v2649_v53 }
 0x3a6   : > { %v4038_v7 = vpop.eup %4037 }
 0x3a7   : > { %v2653_v39 = vadd.f32 1.0, %v4038_v7 }
 0x3a9   : > { %4043 = vrcp.f32 %v2653_v39 }
 0x3aa   : > { %v4040_v60 = vpop.eup %4039  ;;  %4045 = vtanh.f32 %v3340_v58 }
 0x3ab   : > { %v3344_v1 = vadd.f32 1.0, %v4040_v60  ;;  %v4042_v63 = vpop.eup %4041 }
 0x3ad   : > { %4047 = vrcp.f32 %v3344_v1 }
 0x3ae   : > { %4049 = vpow2.f32 %v2658_v26 }
 0x3af   : > { %4051 = vpow2.f32 %v3349_v11 }
 0x3b3   : > { %v4044_v4 = vpop.eup %4043 }
 0x3b4   : > { %v2664_v25 = vmul.f32 %v4044_v4, %v4042_v63  ;;  %v4046_v44 = vpop.eup %4045  ;;  %v2663_v27 = vmul.f32 %v5908_v6, %v4044_v4 }
 0x3b6   : > { %2666 = vrot.lane.b32.xlu1 %v2664_v25, %s4201_s6 }
 0x3b7   : > { %v4048_v28 = vpop.eup %4047 }
 0x3b8   : > { %v3355_v34 = vmul.f32 %v4048_v28, %v4046_v44  ;;  %v4050_v8 = vpop.eup %4049  ;;  %v3354_v3 = vmul.f32 %v5909_v9, %v4048_v28 }
 0x3b9   : > { %v2660_v17 = vadd.f32 1.0, %v4050_v8  ;;  %v4052_v43 = vpop.eup %4051 }
 0x3ba   : > { %3357 = vrot.lane.b32.xlu1 %v3355_v34, %s4201_s6  ;;  %v3351_v61 = vadd.f32 1.0, %v4052_v43 }
 0x3bb   : > { %4053 = vrcp.f32 %v2660_v17 }
 0x3c5   : > { %v4054_v21 = vpop.eup %4053 }
 0x428   : > { %v2667_v5 = vpop.permute.xlu1 %2666 }
 0x429   : > { %v2669_v35 = vadd.f32 %v2667_v5, %v2663_v27  }
 0x42b   : > { %4055 = vtanh.f32 %v2669_v35 }
 0x42c   : > { %v3358_v51 = vpop.permute.xlu1 %3357  ;;  %4057 = vrcp.f32 %v3351_v61 }
 0x42d   : > { %v3360_v48 = vadd.f32 %v3358_v51, %v3354_v3  }
 0x42f   : > { %4059 = vtanh.f32 %v3360_v48 }
 0x435   : > { %v4056_v2 = vpop.eup %4055 }
 0x436   : > { %v2671_v36 = vmul.f32 %v4056_v2, %v4054_v21   ;;  %v4058_v45 = vpop.eup %4057 }
 0x438   : > { %2673 = vrot.lane.b32.xlu0 %v2671_v36, %s4201_s6 }
 0x439   : > { %v4060_v49 = vpop.eup %4059 }
 0x43a   : > { %v3362_v49 = vmul.f32 %v4060_v49, %v4058_v45  }
 0x43c   : > { %3364 = vrot.lane.b32.xlu1 %v3362_v49, %s4201_s6 }
 0x4a9   :  { %1981 = sbr.rel (!%p1979_p10) target bundleno = 499 (0x1f3), region = 71 }
 0x4aa   : > { %v2674_v59 = vpop.permute.xlu0 %2673 }
 0x4ab   : > { %2677 = vst.msk [vmem:[%s2676_s29] sm:$0xff] %vm1998_vm1, %v2674_v59 }
 0x4ae   : > { %v3365_v52 = vpop.permute.xlu1 %3364 }
 0x4af   : > { %3368 = vst.msk [vmem:[%s3367_s30] sm:$0xff] %vm1998_vm1, %v3365_v52 }
 0x4b2   :  { %v3371_v36 = vld [vmem:[#allocation4 + $0x10] sm:$0xff]  ;;  %v3369_v22 = vld [vmem:[#allocation4] sm:$0xff]  ;;  %v3372_v35 = vld [vmem:[#allocation4 + $0x18] sm:$0xff] }
 0x4b3   :  { %v3370_v40 = vld [vmem:[#allocation4 + $0x8] sm:$0xff]  ;;  %v3373_v62 = vld [vmem:[#allocation4 + $0x20] sm:$0xff]  ;;  %v3376_v32 = vld [vmem:[#allocation4 + $0x38] sm:$0xff] }
 0x4b4   :  { %v3374_v30 = vld [vmem:[#allocation4 + $0x28] sm:$0xff]  ;;  %v3375_v13 = vld [vmem:[#allocation4 + $0x30] sm:$0xff] }
 0x4b6   :  { %v3379_v20 = vld [vmem:[#allocation5 + $0x10] sm:$0xff]  ;;  %v3377_v24 = vld [vmem:[#allocation5] sm:$0xff]  ;;  %v3380_v31 = vld [vmem:[#allocation5 + $0x18] sm:$0xff] }
 0x4b7   :  { %3397 = vrot.lane.b32.xlu1 %v3379_v20, %s4203_s8  ;;  %3393 = vrot.lane.b32.xlu0 %v3377_v24, %s4203_s8  ;;  %v3378_v29 = vld [vmem:[#allocation5 + $0x8] sm:$0xff]  ;;  %v3381_v41 = vld [vmem:[#allocation5 + $0x20] sm:$0xff]  ;;  %v3384_v55 = vld [vmem:[#allocation5 + $0x38] sm:$0xff] }
 0x4b8   :  { %v3382_v47 = vld [vmem:[#allocation5 + $0x28] sm:$0xff]  ;;  %v3383_v54 = vld [vmem:[#allocation5 + $0x30] sm:$0xff] }
 0x4bb   :  { %3399 = vrot.lane.b32.xlu1 %v3380_v31, %s4203_s8  ;;  %3395 = vrot.lane.b32.xlu0 %v3378_v29, %s4203_s8 }
 0x4bf   :  { %3403 = vrot.lane.b32.xlu1 %v3382_v47, %s4203_s8  ;;  %3401 = vrot.lane.b32.xlu0 %v3381_v41, %s4203_s8 }
 0x4c3   :  { %3407 = vrot.lane.b32.xlu1 %v3384_v55, %s4203_s8  ;;  %3405 = vrot.lane.b32.xlu0 %v3383_v54, %s4203_s8 }
 0x529   :  { %v3398_v14 = vpop.permute.xlu1 %3397  ;;  %v3394_v33 = vpop.permute.xlu0 %3393 }
 0x52a   :  { %v3420_v57 = vsel %vm1998_vm1, %v3371_v36, %v3398_v14  ;;  %v3418_v10 = vsel %vm1998_vm1, %v3369_v22, %v3394_v33 }
 0x52b   :  { %3428 = vst [vmem:[#allocation12 + $0x10] sm:$0xff] %v3420_v57  ;;  %3426 = vst [vmem:[#allocation12] sm:$0xff] %v3418_v10 }
 0x52d   :  { %v3400_v38 = vpop.permute.xlu1 %3399  ;;  %v3396_v48 = vpop.permute.xlu0 %3395 }
 0x52e   :  { %v3421_v56 = vsel %vm1998_vm1, %v3372_v35, %v3400_v38  ;;  %v3419_v19 = vsel %vm1998_vm1, %v3370_v40, %v3396_v48 }
 0x52f   :  { %3429 = vst [vmem:[#allocation12 + $0x18] sm:$0xff] %v3421_v56  ;;  %3427 = vst [vmem:[#allocation12 + $0x8] sm:$0xff] %v3419_v19 }
 0x531   :  { %v3404_v23 = vpop.permute.xlu1 %3403  ;;  %v3402_v18 = vpop.permute.xlu0 %3401 }
 0x532   :  { %v3423_v16 = vsel %vm1998_vm1, %v3374_v30, %v3404_v23  ;;  %v3422_v37 = vsel %vm1998_vm1, %v3373_v62, %v3402_v18 }
 0x533   :  { %3431 = vst [vmem:[#allocation12 + $0x28] sm:$0xff] %v3423_v16  ;;  %3430 = vst [vmem:[#allocation12 + $0x20] sm:$0xff] %v3422_v37 }
 0x535   :  { %v3408_v42 = vpop.permute.xlu1 %3407  ;;  %v3406_v46 = vpop.permute.xlu0 %3405 }
 0x536   :  { %v3425_v15 = vsel %vm1998_vm1, %v3376_v32, %v3408_v42  ;;  %v3424_v53 = vsel %vm1998_vm1, %v3375_v13, %v3406_v46 }
 0x537   :  { %3433 = vst [vmem:[#allocation12 + $0x38] sm:$0xff] %v3425_v15  ;;  %3432 = vst [vmem:[#allocation12 + $0x30] sm:$0xff] %v3424_v53 }
 0x538   :  { %4138 = shalt.err (!%p4135_p1)
}
 0x539   :  { %s4139_s2 = scalar_lea.hbm %s5580_s7, 1024 }
 0x53a   :  { %p4140_p2 = scmp.ne.s32.totalorder %s5580_s7, %s4139_s2  ;;  %p4143_p3 = scmp.lt.u32.totalorder %s4139_s2, %s5580_s7 }
 0x53c   :  { %p4145_p4 = pnand %p4143_p3, %p4140_p2 }
 0x53e   :  { %4148 = shalt.err (!%p4145_p4)
}
 0x53f   :  { %s4205_s16 = smov 128   ;;  %s4206_s17 = smov 8  }
 0x540   :  { %3445 = dma.vmem_to_hbm [thread:$0]  %s3440_s10, 1024, %s5580_s7, [#allocation8], %s4205_s16, %s4205_s16, %s4206_s17  }
 0x541   :  { %4173 = dma.done.wait [#allocation8], 1024  }
 0x542   :  { %4174 = vsyncadd [#allocation8], 4294966272 }
 0x543   :  { %3449 = vsyncpa [#allocation7], 1 }
 0x544   :  { %3450 = vsyncpa [#allocation10], 1 }
 0x545   :  { %3451 = vsyncpa [#allocation8], 1 }

</bundles_post_ra>
